<compile_context>
chip_gen: v7x
topology: tpu7x:2x2x1
jax: 0.10.0
libtpu: 0.0.40
codegen_flags: <defaults>
</compile_context>

<pallas_src>
import jax
import jax.numpy as jnp
from jax.experimental import pallas as pl
from jax.experimental.pallas import tpu as pltpu


def _round_up(x, m):
    return ((x + m - 1) // m) * m


def _tpu_generation():
    """Best-effort TPU generation (int) from device_kind; None if unknown."""
    try:
        kind = jax.devices()[0].device_kind.lower()
    except Exception:  # pragma: no cover - non-TPU / exotic backends
        return None
    for g in (7, 6, 5, 4, 3, 2):
        if f"v{g}" in kind:
            return g
    return None


def gmmn_kernel(x_ref,
                w1_ref, b1_ref,
                w2_ref, b2_ref,
                w3_ref, b3_ref,
                w4_ref, b4_ref,
                w5_ref, b5_ref,
                o_ref):
    """Fused GMMN forward (5 matmuls + 4 ReLU + sigmoid) for one batch tile.

    Weights are bf16 (MXU-native); MXU accumulation is f32.  The elementwise
    dtype of each layer follows its bias dtype: bf16 biases on v6e/v7x keep
    the ReLU chain and intermediates in bf16, f32 biases (v5e / fallback)
    keep the elementwise path in f32.  The final logits + sigmoid are f32.
    """

    def dense(h, w_ref, b_ref):
        acc = jnp.dot(h.astype(w_ref.dtype), w_ref[...],
                      preferred_element_type=jnp.float32)
        return acc.astype(b_ref.dtype) + b_ref[...]

    h = jnp.maximum(dense(x_ref[...], w1_ref, b1_ref), 0.0)
    h = jnp.maximum(dense(h, w2_ref, b2_ref), 0.0)
    h = jnp.maximum(dense(h, w3_ref, b3_ref), 0.0)
    h = jnp.maximum(dense(h, w4_ref, b4_ref), 0.0)
    logits = dense(h, w5_ref, b5_ref)                    # f32 (b5 is f32)
    # sigmoid(x) == 0.5 * tanh(0.5 x) + 0.5 : one EUP transcendental + one fma
    o_ref[...] = (0.5 * jnp.tanh(0.5 * logits) + 0.5).astype(o_ref.dtype)


def gmmn_forward(x, params, *, batch_tile=512, compute_dtype=jnp.bfloat16,
                 elementwise_dtype=None, min_grid_steps=None,
                 vmem_limit_bytes=48 * 1024 * 1024):
    """x: [B, in_dim] float32; params: dict of (w_k [Din,Dout], b_k [1,Dout]).

    Returns [B, out_dim] float32, matching the PyTorch GMMN forward.
    """
    B, in_dim = x.shape
    out_dim = params["w5"].shape[1]
    h4_dim = params["w4"].shape[1]            # 784

    gen = _tpu_generation()
    if elementwise_dtype is None:
        # bf16 VALU exists on v6e/v7x; keep f32 elementwise on v5e / unknown.
        elementwise_dtype = jnp.bfloat16 if (gen is not None and gen >= 6) else jnp.float32
    if min_grid_steps is None:
        # v7x has 2 TensorCores; a single-step grid idles one of them.
        min_grid_steps = 2 if gen == 7 else 1

    # ---- zero-pad feature dims so every lane tile is full (128) ------------
    h1_pad = _round_up(64, 128)               # 64  -> 128
    h4_pad = _round_up(h4_dim, 128)           # 784 -> 896
    out_pad = _round_up(max(out_dim, 128), 128)

    def pad2(a, rows, cols):
        return jnp.pad(a, ((0, rows - a.shape[0]), (0, cols - a.shape[1])))

    w = {k: params[f"w{k}"] for k in range(1, 6)}
    b = {k: params[f"b{k}"] for k in range(1, 6)}
    w[1] = pad2(w[1], w[1].shape[0], h1_pad)  # pad 64 output cols -> 128
    b[1] = pad2(b[1], 1, h1_pad)
    w[2] = pad2(w[2], h1_pad, w[2].shape[1])  # pad 64 input rows -> 128
    w[4] = pad2(w[4], w[4].shape[0], h4_pad)  # pad 784 output cols -> 896
    b[4] = pad2(b[4], 1, h4_pad)
    w[5] = pad2(w[5], h4_pad, out_pad)        # pad K rows and out cols
    b[5] = pad2(b[5], 1, out_pad)

    weight_args = []
    for k in range(1, 6):
        weight_args.append(w[k].astype(compute_dtype))   # bf16 weights (f32 acc)
        # hidden biases in the elementwise dtype; final bias stays f32
        bias_dtype = jnp.float32 if k == 5 else elementwise_dtype
        weight_args.append(b[k].astype(bias_dtype))

    # ---- choose the batch tile ---------------------------------------------
    # Clamp so small batches don't pay for a full 512-row tile; keep the
    # sublane dim a multiple of 16 (safe for bf16 packing).
    tile = min(batch_tile, _round_up(B, 16))
    if min_grid_steps > 1:
        per_core = _round_up(-(-B // min_grid_steps), 16)
        tile = min(tile, max(16, per_core))
    tile = max(tile, 16)

    B_pad = _round_up(B, tile)
    if B_pad != B:
        x = jnp.pad(x, ((0, B_pad - B), (0, 0)))
    x = x.astype(compute_dtype)               # bf16 input: half the DMA bytes

    def full_spec(arr):
        # whole (tiny) weight / bias resident in VMEM for every grid step
        return pl.BlockSpec(arr.shape, lambda i: (0, 0))

    in_specs = [pl.BlockSpec((tile, in_dim), lambda i: (i, 0))]
    for a in weight_args:
        in_specs.append(full_spec(a))

    out_spec = pl.BlockSpec((tile, out_pad), lambda i: (i, 0))

    out = pl.pallas_call(
        gmmn_kernel,
        out_shape=jax.ShapeDtypeStruct((B_pad, out_pad), jnp.bfloat16),
        grid_spec=pltpu.PrefetchScalarGridSpec(
            num_scalar_prefetch=0,
            grid=(B_pad // tile,),
            in_specs=in_specs,
            out_specs=out_spec,
        ),
        compiler_params=pltpu.CompilerParams(
            dimension_semantics=("parallel",),
            vmem_limit_bytes=vmem_limit_bytes,
        ),
    )(x, *weight_args)

    return out[:B, :out_dim].astype(jnp.float32)


def init_gmmn_params(in_dim, out_dim, key):
    """Deterministic init mimicking torch.nn.Linear default (U[-1/sqrt(fan_in), +])."""
    dims = [in_dim, 64, 256, 256, 784, out_dim]
    params = {}
    for k in range(1, 6):
        fan_in, fan_out = dims[k - 1], dims[k]
        key, kw, kb = jax.random.split(key, 3)
        bound = 1.0 / jnp.sqrt(jnp.float32(fan_in))
        # stored as [fan_in, fan_out] (transpose of torch's [out, in])
        params[f"w{k}"] = jax.random.uniform(
            kw, (fan_in, fan_out), jnp.float32, -bound, bound)
        params[f"b{k}"] = jax.random.uniform(
            kb, (1, fan_out), jnp.float32, -bound, bound)
    return params


def gmmn_reference(x, params):
    """Pure-JAX f32 reference of the same forward pass."""
    h = x
    for k in range(1, 5):
        h = jnp.maximum(h @ params[f"w{k}"] + params[f"b{k}"], 0.0)
    return jax.nn.sigmoid(h @ params["w5"] + params["b5"])


if __name__ == "__main__":
    key = jax.random.PRNGKey(0)
    kx, kp = jax.random.split(key)

    B, in_dim, out_dim = 8, 32, 16
    x = jax.random.uniform(kx, (B, in_dim), jnp.float32)  # "samples from the uniform"
    params = init_gmmn_params(in_dim, out_dim, kp)

    out = gmmn_forward(x, params)          # tile auto-clamped to 16 for B=8
    out = jax.block_until_ready(out)

    ref = gmmn_reference(x, params)
    assert out.shape == (B, out_dim)
    # bf16 matmul inputs / bf16 output (f32 accumulation) vs f32 reference
    assert jnp.max(jnp.abs(out - ref)) < 3e-2, jnp.max(jnp.abs(out - ref))

    print("KERNEL_OK")
</pallas_src>

<mosaic_0001>
module attributes {stable_mosaic.version = 11 : i64} {
  func.func @gmmn_kernel(%arg0: i32, %arg1: memref<16x32xbf16, #tpu.memory_space<vmem>>, %arg2: memref<32x128xbf16, #tpu.memory_space<vmem>>, %arg3: memref<1x128xf32, #tpu.memory_space<vmem>>, %arg4: memref<128x256xbf16, #tpu.memory_space<vmem>>, %arg5: memref<1x256xf32, #tpu.memory_space<vmem>>, %arg6: memref<256x256xbf16, #tpu.memory_space<vmem>>, %arg7: memref<1x256xf32, #tpu.memory_space<vmem>>, %arg8: memref<256x896xbf16, #tpu.memory_space<vmem>>, %arg9: memref<1x896xf32, #tpu.memory_space<vmem>>, %arg10: memref<896x128xbf16, #tpu.memory_space<vmem>>, %arg11: memref<1x128xf32, #tpu.memory_space<vmem>>, %arg12: memref<16x128xbf16, #tpu.memory_space<vmem>>) attributes {dimension_semantics = [#tpu.dimension_semantics<parallel>], iteration_bounds = array<i64: 1>, scalar_prefetch = 0 : i64, scratch_operands = 0 : i64, tpu.core_type = #tpu.core_type<tc>, window_params = [{transform_indices = @transform_0, window_bounds = array<i64: 16, 32>}, {pipeline_mode = #tpu.pipeline_mode<synchronous>, transform_indices = @transform_1, window_bounds = array<i64: 32, 128>}, {pipeline_mode = #tpu.pipeline_mode<synchronous>, transform_indices = @transform_2, window_bounds = array<i64: 1, 128>}, {pipeline_mode = #tpu.pipeline_mode<synchronous>, transform_indices = @transform_3, window_bounds = array<i64: 128, 256>}, {pipeline_mode = #tpu.pipeline_mode<synchronous>, transform_indices = @transform_4, window_bounds = array<i64: 1, 256>}, {pipeline_mode = #tpu.pipeline_mode<synchronous>, transform_indices = @transform_5, window_bounds = array<i64: 256, 256>}, {pipeline_mode = #tpu.pipeline_mode<synchronous>, transform_indices = @transform_6, window_bounds = array<i64: 1, 256>}, {pipeline_mode = #tpu.pipeline_mode<synchronous>, transform_indices = @transform_7, window_bounds = array<i64: 256, 896>}, {pipeline_mode = #tpu.pipeline_mode<synchronous>, transform_indices = @transform_8, window_bounds = array<i64: 1, 896>}, {pipeline_mode = #tpu.pipeline_mode<synchronous>, transform_indices = @transform_9, window_bounds = array<i64: 896, 128>}, {pipeline_mode = #tpu.pipeline_mode<synchronous>, transform_indices = @transform_10, window_bounds = array<i64: 1, 128>}, {transform_indices = @transform_11, window_bounds = array<i64: 16, 128>}]} {
    %c0 = arith.constant 0 : index
    %c0_0 = arith.constant 0 : index
    %0 = vector.load %arg1[%c0, %c0_0] : memref<16x32xbf16, #tpu.memory_space<vmem>>, vector<16x32xbf16>
    %c0_1 = arith.constant 0 : index
    %c0_2 = arith.constant 0 : index
    %1 = vector.load %arg2[%c0_1, %c0_2] : memref<32x128xbf16, #tpu.memory_space<vmem>>, vector<32x128xbf16>
    %cst = arith.constant dense<0.000000e+00> : vector<16x128xf32>
    %2 = tpu.matmul %0, %1, %cst {dimension_numbers = #tpu.dot_dimension_numbers<[1], [0], [0], [1], [0, 0, 1, 1], [], []>} : vector<16x32xbf16>, vector<32x128xbf16>, vector<16x128xf32> -> vector<16x128xf32>
    %c0_3 = arith.constant 0 : index
    %c0_4 = arith.constant 0 : index
    %3 = vector.load %arg3[%c0_3, %c0_4] : memref<1x128xf32, #tpu.memory_space<vmem>>, vector<1x128xf32>
    %4 = vector.broadcast %3 : vector<1x128xf32> to vector<16x128xf32>
    %5 = arith.addf %2, %4 : vector<16x128xf32>
    %cst_5 = arith.constant 0.000000e+00 : f32
    %6 = vector.broadcast %cst_5 : f32 to vector<16x128xf32>
    %7 = arith.maximumf %5, %6 : vector<16x128xf32>
    %8 = arith.truncf %7 : vector<16x128xf32> to vector<16x128xbf16>
    %c0_6 = arith.constant 0 : index
    %c0_7 = arith.constant 0 : index
    %9 = vector.load %arg4[%c0_6, %c0_7] : memref<128x256xbf16, #tpu.memory_space<vmem>>, vector<128x256xbf16>
    %cst_8 = arith.constant dense<0.000000e+00> : vector<16x256xf32>
    %10 = tpu.matmul %8, %9, %cst_8 {dimension_numbers = #tpu.dot_dimension_numbers<[1], [0], [0], [1], [0, 0, 1, 1], [], []>} : vector<16x128xbf16>, vector<128x256xbf16>, vector<16x256xf32> -> vector<16x256xf32>
    %c0_9 = arith.constant 0 : index
    %c0_10 = arith.constant 0 : index
    %11 = vector.load %arg5[%c0_9, %c0_10] : memref<1x256xf32, #tpu.memory_space<vmem>>, vector<1x256xf32>
    %12 = vector.broadcast %11 : vector<1x256xf32> to vector<16x256xf32>
    %13 = arith.addf %10, %12 : vector<16x256xf32>
    %cst_11 = arith.constant 0.000000e+00 : f32
    %14 = vector.broadcast %cst_11 : f32 to vector<16x256xf32>
    %15 = arith.maximumf %13, %14 : vector<16x256xf32>
    %16 = arith.truncf %15 : vector<16x256xf32> to vector<16x256xbf16>
    %c0_12 = arith.constant 0 : index
    %c0_13 = arith.constant 0 : index
    %17 = vector.load %arg6[%c0_12, %c0_13] : memref<256x256xbf16, #tpu.memory_space<vmem>>, vector<256x256xbf16>
    %cst_14 = arith.constant dense<0.000000e+00> : vector<16x256xf32>
    %18 = tpu.matmul %16, %17, %cst_14 {dimension_numbers = #tpu.dot_dimension_numbers<[1], [0], [0], [1], [0, 0, 1, 1], [], []>} : vector<16x256xbf16>, vector<256x256xbf16>, vector<16x256xf32> -> vector<16x256xf32>
    %c0_15 = arith.constant 0 : index
    %c0_16 = arith.constant 0 : index
    %19 = vector.load %arg7[%c0_15, %c0_16] : memref<1x256xf32, #tpu.memory_space<vmem>>, vector<1x256xf32>
    %20 = vector.broadcast %19 : vector<1x256xf32> to vector<16x256xf32>
    %21 = arith.addf %18, %20 : vector<16x256xf32>
    %cst_17 = arith.constant 0.000000e+00 : f32
    %22 = vector.broadcast %cst_17 : f32 to vector<16x256xf32>
    %23 = arith.maximumf %21, %22 : vector<16x256xf32>
    %24 = arith.truncf %23 : vector<16x256xf32> to vector<16x256xbf16>
    %c0_18 = arith.constant 0 : index
    %c0_19 = arith.constant 0 : index
    %25 = vector.load %arg8[%c0_18, %c0_19] : memref<256x896xbf16, #tpu.memory_space<vmem>>, vector<256x896xbf16>
    %cst_20 = arith.constant dense<0.000000e+00> : vector<16x896xf32>
    %26 = tpu.matmul %24, %25, %cst_20 {dimension_numbers = #tpu.dot_dimension_numbers<[1], [0], [0], [1], [0, 0, 1, 1], [], []>} : vector<16x256xbf16>, vector<256x896xbf16>, vector<16x896xf32> -> vector<16x896xf32>
    %c0_21 = arith.constant 0 : index
    %c0_22 = arith.constant 0 : index
    %27 = vector.load %arg9[%c0_21, %c0_22] : memref<1x896xf32, #tpu.memory_space<vmem>>, vector<1x896xf32>
    %28 = vector.broadcast %27 : vector<1x896xf32> to vector<16x896xf32>
    %29 = arith.addf %26, %28 : vector<16x896xf32>
    %cst_23 = arith.constant 0.000000e+00 : f32
    %30 = vector.broadcast %cst_23 : f32 to vector<16x896xf32>
    %31 = arith.maximumf %29, %30 : vector<16x896xf32>
    %32 = arith.truncf %31 : vector<16x896xf32> to vector<16x896xbf16>
    %c0_24 = arith.constant 0 : index
    %c0_25 = arith.constant 0 : index
    %33 = vector.load %arg10[%c0_24, %c0_25] : memref<896x128xbf16, #tpu.memory_space<vmem>>, vector<896x128xbf16>
    %cst_26 = arith.constant dense<0.000000e+00> : vector<16x128xf32>
    %34 = tpu.matmul %32, %33, %cst_26 {dimension_numbers = #tpu.dot_dimension_numbers<[1], [0], [0], [1], [0, 0, 1, 1], [], []>} : vector<16x896xbf16>, vector<896x128xbf16>, vector<16x128xf32> -> vector<16x128xf32>
    %c0_27 = arith.constant 0 : index
    %c0_28 = arith.constant 0 : index
    %35 = vector.load %arg11[%c0_27, %c0_28] : memref<1x128xf32, #tpu.memory_space<vmem>>, vector<1x128xf32>
    %36 = vector.broadcast %35 : vector<1x128xf32> to vector<16x128xf32>
    %37 = arith.addf %34, %36 : vector<16x128xf32>
    %cst_29 = arith.constant 5.000000e-01 : f32
    %38 = vector.broadcast %cst_29 : f32 to vector<16x128xf32>
    %39 = arith.mulf %38, %37 : vector<16x128xf32>
    %40 = math.tanh %39 : vector<16x128xf32>
    %cst_30 = arith.constant 5.000000e-01 : f32
    %41 = vector.broadcast %cst_30 : f32 to vector<16x128xf32>
    %42 = arith.mulf %41, %40 : vector<16x128xf32>
    %cst_31 = arith.constant 5.000000e-01 : f32
    %43 = vector.broadcast %cst_31 : f32 to vector<16x128xf32>
    %44 = arith.addf %42, %43 : vector<16x128xf32>
    %45 = arith.truncf %44 : vector<16x128xf32> to vector<16x128xbf16>
    %c0_32 = arith.constant 0 : index
    %c0_33 = arith.constant 0 : index
    %46 = vector.load %arg12[%c0_32, %c0_33] : memref<16x128xbf16, #tpu.memory_space<vmem>>, vector<16x128xbf16>
    tpu.vector_store %arg12[%c0_32, %c0_33], %45 {strides = array<i32>} : memref<16x128xbf16, #tpu.memory_space<vmem>>, vector<16x128xbf16>,
    return
  }
  func.func @transform_0(%arg0: i32) -> (i32, i32) {
    %c0_i32 = arith.constant 0 : i32
    %c0_i32_0 = arith.constant 0 : i32
    return %arg0, %c0_i32 : i32, i32
  }
  func.func @transform_1(%arg0: i32) -> (i32, i32) {
    %c0_i32 = arith.constant 0 : i32
    %c0_i32_0 = arith.constant 0 : i32
    %c0_i32_1 = arith.constant 0 : i32
    return %c0_i32, %c0_i32_0 : i32, i32
  }
  func.func @transform_2(%arg0: i32) -> (i32, i32) {
    %c0_i32 = arith.constant 0 : i32
    %c0_i32_0 = arith.constant 0 : i32
    %c0_i32_1 = arith.constant 0 : i32
    return %c0_i32, %c0_i32_0 : i32, i32
  }
  func.func @transform_3(%arg0: i32) -> (i32, i32) {
    %c0_i32 = arith.constant 0 : i32
    %c0_i32_0 = arith.constant 0 : i32
    %c0_i32_1 = arith.constant 0 : i32
    return %c0_i32, %c0_i32_0 : i32, i32
  }
  func.func @transform_4(%arg0: i32) -> (i32, i32) {
    %c0_i32 = arith.constant 0 : i32
    %c0_i32_0 = arith.constant 0 : i32
    %c0_i32_1 = arith.constant 0 : i32
    return %c0_i32, %c0_i32_0 : i32, i32
  }
  func.func @transform_5(%arg0: i32) -> (i32, i32) {
    %c0_i32 = arith.constant 0 : i32
    %c0_i32_0 = arith.constant 0 : i32
    %c0_i32_1 = arith.constant 0 : i32
    return %c0_i32, %c0_i32_0 : i32, i32
  }
  func.func @transform_6(%arg0: i32) -> (i32, i32) {
    %c0_i32 = arith.constant 0 : i32
    %c0_i32_0 = arith.constant 0 : i32
    %c0_i32_1 = arith.constant 0 : i32
    return %c0_i32, %c0_i32_0 : i32, i32
  }
  func.func @transform_7(%arg0: i32) -> (i32, i32) {
    %c0_i32 = arith.constant 0 : i32
    %c0_i32_0 = arith.constant 0 : i32
    %c0_i32_1 = arith.constant 0 : i32
    return %c0_i32, %c0_i32_0 : i32, i32
  }
  func.func @transform_8(%arg0: i32) -> (i32, i32) {
    %c0_i32 = arith.constant 0 : i32
    %c0_i32_0 = arith.constant 0 : i32
    %c0_i32_1 = arith.constant 0 : i32
    return %c0_i32, %c0_i32_0 : i32, i32
  }
  func.func @transform_9(%arg0: i32) -> (i32, i32) {
    %c0_i32 = arith.constant 0 : i32
    %c0_i32_0 = arith.constant 0 : i32
    %c0_i32_1 = arith.constant 0 : i32
    return %c0_i32, %c0_i32_0 : i32, i32
  }
  func.func @transform_10(%arg0: i32) -> (i32, i32) {
    %c0_i32 = arith.constant 0 : i32
    %c0_i32_0 = arith.constant 0 : i32
    %c0_i32_1 = arith.constant 0 : i32
    return %c0_i32, %c0_i32_0 : i32, i32
  }
  func.func @transform_11(%arg0: i32) -> (i32, i32) {
    %c0_i32 = arith.constant 0 : i32
    %c0_i32_0 = arith.constant 0 : i32
    return %arg0, %c0_i32 : i32, i32
  }
}

</mosaic_0001>

<bundles_post_ra>
// kernel: tpu_custom_call.1
= control target key start
LH: loop header
LB: loop body
LE: loop exit
PB: predicated region body
PF: predicated region fallthrough
CT: control target
= control target key end

     0   :  { %16 = vsyncpa [#allocation3], 0  ;;  %s3274_s0 = inlined_call_operand.hbm [shape: bf16[16,32], index: 0, kind: input, shape index: {}]   ;;  %s3275_s1 = inlined_call_operand.hbm [shape: bf16[32,128], index: 1, kind: input, shape index: {}]   ;;  %s3276_s2 = inlined_call_operand.vmem [shape: f32[1,128], index: 2, kind: input, shape index: {}]   ;;  %s3277_s3 = inlined_call_operand.hbm [shape: bf16[128,256], index: 3, kind: input, shape index: {}]   ;;  %s3278_s4 = inlined_call_operand.vmem [shape: f32[1,256], index: 4, kind: input, shape index: {}]   ;;  %s3279_s5 = inlined_call_operand.hbm [shape: bf16[256,256], index: 5, kind: input, shape index: {}]   ;;  %s3280_s6 = inlined_call_operand.vmem [shape: f32[1,256], index: 6, kind: input, shape index: {}]   ;;  %s3281_s7 = inlined_call_operand.hbm [shape: bf16[256,896], index: 7, kind: input, shape index: {}]   ;;  %s3282_s8 = inlined_call_operand.vmem [shape: f32[1,896], index: 8, kind: input, shape index: {}]   ;;  %s3283_s9 = inlined_call_operand.hbm [shape: bf16[896,128], index: 9, kind: input, shape index: {}]   ;;  %s3284_s10 = inlined_call_operand.vmem [shape: f32[1,128], index: 10, kind: input, shape index: {}]   ;;  %s3285_s11 = inlined_call_operand.hbm [shape: bf16[16,128], index: 11, kind: output, shape index: {}]  }
   0x1   :  { %17 = vsyncpa [#allocation6], 0 }
   0x2   :  { %18 = vsyncpa [#allocation9], 0 }
   0x3   :  { %19 = vsyncpa [#allocation12], 0 }
   0x4   :  { %20 = vsyncpa [#allocation4], 0  ;;  %s3033_s17 = smov [#allocation5]   ;;  %s2869_s21 = scalar_lea.hbm %s3275_s1, 256 }
   0x5   :  { %s38_s18 = sshll.u32 %s3033_s17, 4  ;;  %p2870_p0 = scmp.ne.s32.totalorder %s3275_s1, %s2869_s21  ;;  %s39_s18 = int_to_ptr.vmem [resolvable:$true] %s38_s18 }
   0x6   :  { %p2873_p1 = scmp.lt.u32.totalorder %s2869_s21, %s3275_s1 }
   0x8   :  { %p2875_p2 = pnand %p2873_p1, %p2870_p0 }
   0xa   :  { %2878 = shalt.err (!%p2875_p2)
}
   0xb   :  { %s2879_s26 = scalar_lea.vmem %s39_s18, 256  ;;  %p2884_p4 = scmp.lt.s32.totalorder %s39_s18, %s39_s18 }
   0xc   :  { %p2880_p3 = scmp.ne.s32.totalorder %s39_s18, %s2879_s26  ;;  %p2885_p5 = scmp.lt.s32.totalorder %s2879_s26, %s2879_s26 }
   0xe   :  { %p2886_p6 = por %p2885_p5, %p2884_p4 }
  0x10   :  { %p2887_p7 = pnand %p2886_p6, %p2880_p3 }
  0x12   :  { %2890 = shalt.err (!%p2887_p7)
}
  0x13   :  { %s3034_s27 = smov 64   ;;  %s3035_s28 = smov 4  }
  0x14   :  { %44 = dma.hbm_to_vmem [thread:$0]  %s3275_s1, 256, %s39_s18, [#allocation6], %s3034_s27, %s3034_s27, %s3035_s28  }
  0x15   :  { %s3036_s12 = smov [#allocation8]   ;;  %s3037_s14 = smov [#allocation2]  }
  0x16   :  { %s66_s13 = sshll.u32 %s3036_s12, 4  ;;  %s26_s15 = sshll.u32 %s3037_s14, 4  ;;  %s67_s13 = int_to_ptr.vmem [resolvable:$true] %s66_s13  ;;  %s27_s15 = int_to_ptr.vmem [resolvable:$true] %s26_s15 }
  0x17   :  { %s2891_s19 = scalar_lea.hbm %s3279_s5, 4096 }
  0x18   :  { %p2892_p8 = scmp.ne.s32.totalorder %s3279_s5, %s2891_s19  ;;  %p2895_p9 = scmp.lt.u32.totalorder %s2891_s19, %s3279_s5 }
  0x1a   :  { %p2897_p10 = pnand %p2895_p9, %p2892_p8 }
  0x1c   :  { %2900 = shalt.err (!%p2897_p10)
}
  0x1d   :  { %s2901_s1 = scalar_lea.vmem %s67_s13, 4096  ;;  %p2906_p12 = scmp.lt.s32.totalorder %s67_s13, %s67_s13 }
  0x1e   :  { %p2902_p11 = scmp.ne.s32.totalorder %s67_s13, %s2901_s1  ;;  %p2907_p13 = scmp.lt.s32.totalorder %s2901_s1, %s2901_s1 }
  0x20   :  { %p2908_p0 = por %p2907_p13, %p2906_p12 }
  0x22   :  { %p2909_p1 = pnand %p2908_p0, %p2902_p11 }
  0x24   :  { %2912 = shalt.err (!%p2909_p1)
}
  0x25   :  { %s3038_s18 = smov 128   ;;  %s3039_s24 = smov 8  }
  0x26   :  { %72 = dma.hbm_to_vmem [thread:$0]  %s3279_s5, 4096, %s67_s13, [#allocation9], %s3038_s18, %s3038_s18, %s3039_s24  }
  0x27   :  { %s2913_s12 = scalar_lea.hbm %s3274_s0, 128 }
  0x28   :  { %p2914_p2 = scmp.ne.s32.totalorder %s3274_s0, %s2913_s12  ;;  %p2917_p3 = scmp.lt.u32.totalorder %s2913_s12, %s3274_s0 }
  0x2a   :  { %p2919_p4 = pnand %p2917_p3, %p2914_p2 }
  0x2c   :  { %2922 = shalt.err (!%p2919_p4)
}
  0x2d   :  { %s2923_s20 = scalar_lea.vmem %s27_s15, 128  ;;  %p2928_p6 = scmp.lt.s32.totalorder %s27_s15, %s27_s15 }
  0x2e   :  { %p2924_p5 = scmp.ne.s32.totalorder %s27_s15, %s2923_s20  ;;  %p2929_p7 = scmp.lt.s32.totalorder %s2923_s20, %s2923_s20 }
  0x30   :  { %p2930_p8 = por %p2929_p7, %p2928_p6 }
  0x32   :  { %p2931_p9 = pnand %p2930_p8, %p2924_p5 }
  0x34   :  { %2934 = shalt.err (!%p2931_p9)
}
  0x35   :  { %32 = dma.hbm_to_vmem [thread:$0]  %s3274_s0, 128, %s27_s15, [#allocation3], %s3034_s27, %s3034_s27, %s3035_s28  }
  0x36   :  { %s3040_s21 = smov [#allocation7]   ;;  %s3041_s23 = smov [#allocation10]  }
  0x37   :  { %s52_s22 = sshll.u32 %s3040_s21, 4  ;;  %s80_s1 = sshll.u32 %s3041_s23, 4  ;;  %s53_s22 = int_to_ptr.vmem [resolvable:$true] %s52_s22  ;;  %s81_s1 = int_to_ptr.vmem [resolvable:$true] %s80_s1 }
  0x38   :  { %s2935_s29 = scalar_lea.hbm %s3277_s3, 2048 }
  0x39   :  { %p2936_p10 = scmp.ne.s32.totalorder %s3277_s3, %s2935_s29  ;;  %p2939_p11 = scmp.lt.u32.totalorder %s2935_s29, %s3277_s3 }
  0x3b   :  { %p2941_p12 = pnand %p2939_p11, %p2936_p10 }
  0x3d   :  { %2944 = shalt.err (!%p2941_p12)
}
  0x3e   :  { %s2945_s0 = scalar_lea.vmem %s53_s22, 2048  ;;  %p2950_p0 = scmp.lt.s32.totalorder %s53_s22, %s53_s22 }
  0x3f   :  { %p2946_p13 = scmp.ne.s32.totalorder %s53_s22, %s2945_s0  ;;  %p2951_p1 = scmp.lt.s32.totalorder %s2945_s0, %s2945_s0 }
  0x41   :  { %p2952_p2 = por %p2951_p1, %p2950_p0 }
  0x43   :  { %p2953_p3 = pnand %p2952_p2, %p2946_p13 }
  0x45   :  { %2956 = shalt.err (!%p2953_p3)
}
  0x46   :  { %58 = dma.hbm_to_vmem [thread:$0]  %s3277_s3, 2048, %s53_s22, [#allocation6], %s3038_s18, %s3038_s18, %s3039_s24  }
  0x47   :  { %s2957_s5 = scalar_lea.hbm %s3281_s7, 14336 }
  0x48   :  { %p2958_p4 = scmp.ne.s32.totalorder %s3281_s7, %s2957_s5  ;;  %p2961_p5 = scmp.lt.u32.totalorder %s2957_s5, %s3281_s7 }
  0x4a   :  { %p2963_p6 = pnand %p2961_p5, %p2958_p4 }
  0x4c   :  { %2966 = shalt.err (!%p2963_p6)
}
  0x4d   :  { %s2967_s26 = scalar_lea.vmem %s81_s1, 14336  ;;  %p2972_p8 = scmp.lt.s32.totalorder %s81_s1, %s81_s1 }
  0x4e   :  { %p2968_p7 = scmp.ne.s32.totalorder %s81_s1, %s2967_s26  ;;  %p2973_p9 = scmp.lt.s32.totalorder %s2967_s26, %s2967_s26 }
  0x50   :  { %p2974_p10 = por %p2973_p9, %p2972_p8 }
  0x52   :  { %p2975_p11 = pnand %p2974_p10, %p2968_p7 }
  0x54   :  { %2978 = shalt.err (!%p2975_p11)
}
  0x55   :  { %s3042_s3 = smov 448   ;;  %s3043_s18 = smov 28  }
  0x56   :  { %86 = dma.hbm_to_vmem [thread:$0]  %s3281_s7, 14336, %s81_s1, [#allocation9], %s3042_s3, %s3042_s3, %s3043_s18  }
  0x57   :  { %s3044_s29 = smov [#allocation11]   ;;  %s2979_s16 = scalar_lea.hbm %s3283_s9, 7168 }
  0x58   :  { %s94_s30 = sshll.u32 %s3044_s29, 4  ;;  %p2980_p12 = scmp.ne.s32.totalorder %s3283_s9, %s2979_s16  ;;  %s95_s30 = int_to_ptr.vmem [resolvable:$true] %s94_s30 }
  0x59   :  { %p2983_p13 = scmp.lt.u32.totalorder %s2979_s16, %s3283_s9 }
  0x5b   :  { %p2985_p0 = pnand %p2983_p13, %p2980_p12 }
  0x5d   :  { %2988 = shalt.err (!%p2985_p0)
}
  0x5e   :  { %s2989_s20 = scalar_lea.vmem %s95_s30, 7168  ;;  %p2994_p2 = scmp.lt.s32.totalorder %s95_s30, %s95_s30 }
  0x5f   :  { %p2990_p1 = scmp.ne.s32.totalorder %s95_s30, %s2989_s20  ;;  %p2995_p3 = scmp.lt.s32.totalorder %s2989_s20, %s2989_s20 }
  0x61   :  { %p2996_p4 = por %p2995_p3, %p2994_p2 }
  0x63   :  { %p2997_p5 = pnand %p2996_p4, %p2990_p1 }
  0x65   :  { %3000 = shalt.err (!%p2997_p5)
}
  0x66   :  { %100 = dma.hbm_to_vmem [thread:$0]  %s3283_s9, 7168, %s95_s30, [#allocation12], %s3034_s27, %s3034_s27, %s3035_s28  }
  0x67   :  { %3023 = dma.done.wait [#allocation3], 128  }
  0x68   :  { %3024 = vsyncadd [#allocation3], 4294967168 }
  0x69   :  { %3025 = dma.done.wait [#allocation6], 2304  }
  0x6a   :  { %3026 = vsyncadd [#allocation6], 4294964992 }
  0x6b   :  { %3027 = dma.done.wait [#allocation9], 18432  }
  0x6c   :  { %3028 = vsyncadd [#allocation9], 4294948864 }
  0x6d   :  { %3029 = dma.done.wait [#allocation12], 7168  }
  0x6e   :  { %3030 = vsyncadd [#allocation12], 4294960128  ;;  %v3045_v0 = vmov 0.0   ;;  %vm3046_vm0 = vmmov 0   ;;  %v2574_v1 = vld [vmem:[#allocation5] sm:$0xff]   ;;  %v2575_v2 = vld [vmem:[#allocation5 + $0x8] sm:$0xff]  }
  0x6f   :  { %2530 = vmatprep.subr.bf16.mxu0 %v3045_v0  ;;  %2534 = vmatprep.mubr.msk.bf16.mxu0 %vm3046_vm0, %v3045_v0  ;;  %v2577_v3 = vld [vmem:[#allocation7 + $0x4] ss:$8 sps:$4 sm:$0xff]   ;;  %v2579_v4 = vld [vmem:[#allocation7] ss:$8 sps:$4 sm:$0xff]   ;;  %v2580_v6 = vld [vmem:[#allocation7 + $0x14] ss:$8 sps:$4 sm:$0xff]  }
  0x70   :  { %2531 = vmatpush3.bf16.msra.mxu0 %v2574_v1  ;;  %v2576_v5 = vld [vmem:[#allocation2] sm:$0xff]   ;;  %308 = vmatprep.subr.bf16.mxu1 %v2577_v3  ;;  %vm152_vm1 = vcmask 261120   ;;  %v2582_v7 = vld [vmem:[#allocation7 + $0x10] ss:$8 sps:$4 sm:$0xff]   ;;  %v2586_v10 = vld [vmem:[#allocation7 + $0x34] ss:$8 sps:$4 sm:$0xff]  }
  0x71   :  { %2532 = vmatprep.subr.bf16.mxu0 %v3045_v0  ;;  %309 = vmatpush1.bf16.msra.mxu1 %v2579_v4  ;;  %v2583_v8 = vld [vmem:[#allocation7 + $0x24] ss:$8 sps:$4 sm:$0xff]   ;;  %v2585_v9 = vld [vmem:[#allocation7 + $0x20] ss:$8 sps:$4 sm:$0xff]   ;;  %v2588_v11 = vld [vmem:[#allocation7 + $0x30] ss:$8 sps:$4 sm:$0xff]  }
  0x72   :  { %310 = vmatprep.subr.bf16.mxu1 %v2580_v6  ;;  %v2589_v12 = vld [vmem:[#allocation7 + $0x44] ss:$8 sps:$4 sm:$0xff]   ;;  %v2591_v13 = vld [vmem:[#allocation7 + $0x40] ss:$8 sps:$4 sm:$0xff]   ;;  %v2592_v14 = vld [vmem:[#allocation7 + $0x54] ss:$8 sps:$4 sm:$0xff]  }
  0x73   :  { %v2594_v15 = vld [vmem:[#allocation7 + $0x50] ss:$8 sps:$4 sm:$0xff]   ;;  %v2595_v16 = vld [vmem:[#allocation7 + $0x64] ss:$8 sps:$4 sm:$0xff]   ;;  %v2597_v17 = vld [vmem:[#allocation7 + $0x60] ss:$8 sps:$4 sm:$0xff]  }
  0x74   :  { %2533 = vmatpush3.bf16.msra.mxu0 %v2575_v2  ;;  %v2598_v18 = vld [vmem:[#allocation7 + $0x74] ss:$8 sps:$4 sm:$0xff]   ;;  %v2600_v19 = vld [vmem:[#allocation7 + $0x70] ss:$8 sps:$4 sm:$0xff]   ;;  %v3047_v20 = vmov 0  }
  0x75   :  { %311 = vmatpush1.bf16.msra.mxu1 %v2582_v7  ;;  %340 = vmatprep.mubr.bf16.mxu1 %v3047_v20  ;;  %v2601_v21 = vld [vmem:[#allocation8] ss:$8 sps:$4 sm:$0xff]   ;;  %v2603_v22 = vld [vmem:[#allocation8 + $0x4] ss:$8 sps:$4 sm:$0xff]   ;;  %v2606_v23 = vld [vmem:[#allocation8 + $0x14] ss:$8 sps:$4 sm:$0xff]  }
  0x76   :  { %312 = vmatprep.subr.bf16.mxu1 %v2583_v8  ;;  %561 = vmatprep.subr.bf16.mxu0 %v2603_v22  ;;  %v2604_v24 = vld [vmem:[#allocation8 + $0x10] ss:$8 sps:$4 sm:$0xff]   ;;  %v2609_v25 = vld [vmem:[#allocation8 + $0x24] ss:$8 sps:$4 sm:$0xff]   ;;  %v2607_v26 = vld [vmem:[#allocation8 + $0x20] ss:$8 sps:$4 sm:$0xff]  }
  0x77   :  { %2535 = vmatmul.mubr.msk.bf16.vlgmr.msra.gmra.mrb[0].mxu0 %vm152_vm1, %v2576_v5  ;;  %v2612_v27 = vld [vmem:[#allocation8 + $0x34] ss:$8 sps:$4 sm:$0xff]   ;;  %v2610_v28 = vld [vmem:[#allocation8 + $0x30] ss:$8 sps:$4 sm:$0xff]   ;;  %v2615_v29 = vld [vmem:[#allocation8 + $0x44] ss:$8 sps:$4 sm:$0xff]  }
  0x78   :  { %562 = vmatpush1.bf16.msra.mxu0 %v2601_v21  ;;  %v2613_v30 = vld [vmem:[#allocation8 + $0x40] ss:$8 sps:$4 sm:$0xff]   ;;  %v2618_v31 = vld [vmem:[#allocation8 + $0x54] ss:$8 sps:$4 sm:$0xff]   ;;  %v2616_v32 = vld [vmem:[#allocation8 + $0x50] ss:$8 sps:$4 sm:$0xff]  }
  0x79   :  { %313 = vmatpush1.bf16.msra.mxu1 %v2585_v9  ;;  %563 = vmatprep.subr.bf16.mxu0 %v2606_v23  ;;  %v2621_v33 = vld [vmem:[#allocation8 + $0x64] ss:$8 sps:$4 sm:$0xff]   ;;  %v2619_v34 = vld [vmem:[#allocation8 + $0x60] ss:$8 sps:$4 sm:$0xff]   ;;  %v2624_v35 = vld [vmem:[#allocation8 + $0x74] ss:$8 sps:$4 sm:$0xff]  }
  0x7a   :  { %314 = vmatprep.subr.bf16.mxu1 %v2586_v10  ;;  %v2622_v36 = vld [vmem:[#allocation8 + $0x70] ss:$8 sps:$4 sm:$0xff]   ;;  %v2627_v37 = vld [vmem:[#allocation8 + $0x84] ss:$8 sps:$4 sm:$0xff]   ;;  %v2625_v38 = vld [vmem:[#allocation8 + $0x80] ss:$8 sps:$4 sm:$0xff]  }
  0x7b   :  { %v2630_v39 = vld [vmem:[#allocation8 + $0x94] ss:$8 sps:$4 sm:$0xff]   ;;  %v2628_v40 = vld [vmem:[#allocation8 + $0x90] ss:$8 sps:$4 sm:$0xff]   ;;  %v2633_v41 = vld [vmem:[#allocation8 + $0xa4] ss:$8 sps:$4 sm:$0xff]  }
  0x7c   :  { %564 = vmatpush1.bf16.msra.mxu0 %v2604_v24  ;;  %v2631_v42 = vld [vmem:[#allocation8 + $0xa0] ss:$8 sps:$4 sm:$0xff]   ;;  %v2636_v43 = vld [vmem:[#allocation8 + $0xb4] ss:$8 sps:$4 sm:$0xff]   ;;  %v2634_v44 = vld [vmem:[#allocation8 + $0xb0] ss:$8 sps:$4 sm:$0xff]  }
  0x7d   :  { %315 = vmatpush1.bf16.msra.mxu1 %v2588_v11  ;;  %565 = vmatprep.subr.bf16.mxu0 %v2609_v25  ;;  %v2639_v45 = vld [vmem:[#allocation8 + $0xc4] ss:$8 sps:$4 sm:$0xff]   ;;  %v2637_v46 = vld [vmem:[#allocation8 + $0xc0] ss:$8 sps:$4 sm:$0xff]   ;;  %v2642_v47 = vld [vmem:[#allocation8 + $0xd4] ss:$8 sps:$4 sm:$0xff]  }
  0x7e   :  { %316 = vmatprep.subr.bf16.mxu1 %v2589_v12  ;;  %v2640_v48 = vld [vmem:[#allocation8 + $0xd0] ss:$8 sps:$4 sm:$0xff]   ;;  %v2199_v49 = vld [vmem:[%s3276_s2] ss:$0 sm:$0xff]  ;;  %v2645_v59 = vld [vmem:[#allocation8 + $0xe4] ss:$8 sps:$4 sm:$0xff]  }
  0x7f   :  { %v2643_v60 = vld [vmem:[#allocation8 + $0xe0] ss:$8 sps:$4 sm:$0xff]   ;;  %v2648_v61 = vld [vmem:[#allocation8 + $0xf4] ss:$8 sps:$4 sm:$0xff]   ;;  %v2646_v62 = vld [vmem:[#allocation8 + $0xf0] ss:$8 sps:$4 sm:$0xff]  }
  0x80   :  { %566 = vmatpush1.bf16.msra.mxu0 %v2607_v26  ;;  %v2649_v63 = vld [vmem:[#allocation10] ss:$28 sps:$4 sm:$0xff]   ;;  %v2654_v2 = vld [vmem:[#allocation10 + $0xc] ss:$28 sps:$4 sm:$0xff]   ;;  %v2655_v4 = vld [vmem:[#allocation10 + $0x38] ss:$28 sps:$4 sm:$0xff]  }
  0x81   :  { %317 = vmatpush1.bf16.msra.mxu1 %v2591_v13  ;;  %567 = vmatprep.subr.bf16.mxu0 %v2612_v27  ;;  %v2651_v1 = vld [vmem:[#allocation10 + $0x4] ss:$28 sps:$4 sm:$0xff]   ;;  %v2657_v3 = vld [vmem:[#allocation10 + $0x3c] ss:$28 sps:$4 sm:$0xff]   ;;  %v2663_v5 = vld [vmem:[#allocation10 + $0x74] ss:$28 sps:$4 sm:$0xff]  }
  0x82   :  { %318 = vmatprep.subr.bf16.mxu1 %v2592_v14  ;;  %v2661_v6 = vld [vmem:[#allocation10 + $0x70] ss:$28 sps:$4 sm:$0xff]   ;;  %v2667_v8 = vld [vmem:[#allocation10 + $0xa8] ss:$28 sps:$4 sm:$0xff]   ;;  %v2673_v10 = vld [vmem:[#allocation10 + $0xe0] ss:$28 sps:$4 sm:$0xff]  }
  0x83   :  { %v2669_v7 = vld [vmem:[#allocation10 + $0xac] ss:$28 sps:$4 sm:$0xff]   ;;  %v2675_v9 = vld [vmem:[#allocation10 + $0xe4] ss:$28 sps:$4 sm:$0xff]   ;;  %v2681_v11 = vld [vmem:[#allocation10 + $0x11c] ss:$28 sps:$4 sm:$0xff]  }
  0x84   :  { %568 = vmatpush1.bf16.msra.mxu0 %v2610_v28  ;;  %v2679_v12 = vld [vmem:[#allocation10 + $0x118] ss:$28 sps:$4 sm:$0xff]   ;;  %v2685_v14 = vld [vmem:[#allocation10 + $0x150] ss:$28 sps:$4 sm:$0xff]   ;;  %v2715_v24 = vld [vmem:[#allocation10 + $0x268] ss:$28 sps:$4 sm:$0xff]  }
  0x85   :  { %319 = vmatpush1.bf16.msra.mxu1 %v2594_v15  ;;  %569 = vmatprep.subr.bf16.mxu0 %v2615_v29  ;;  %v2687_v13 = vld [vmem:[#allocation10 + $0x154] ss:$28 sps:$4 sm:$0xff]   ;;  %v2693_v15 = vld [vmem:[#allocation10 + $0x18c] ss:$28 sps:$4 sm:$0xff]   ;;  %v2723_v25 = vld [vmem:[#allocation10 + $0x2a4] ss:$28 sps:$4 sm:$0xff]   ;;  %v218_v29 = vlaneseq }
  0x86   :  { %320 = vmatprep.subr.bf16.mxu1 %v2595_v16  ;;  %v2691_v16 = vld [vmem:[#allocation10 + $0x188] ss:$28 sps:$4 sm:$0xff]   ;;  %v2703_v20 = vld [vmem:[#allocation10 + $0x1f8] ss:$28 sps:$4 sm:$0xff]   ;;  %v2709_v22 = vld [vmem:[#allocation10 + $0x230] ss:$28 sps:$4 sm:$0xff]  }
  0x87   :  { %v2711_v21 = vld [vmem:[#allocation10 + $0x234] ss:$28 sps:$4 sm:$0xff]   ;;  %v2717_v23 = vld [vmem:[#allocation10 + $0x26c] ss:$28 sps:$4 sm:$0xff]   ;;  %v2721_v26 = vld [vmem:[#allocation10 + $0x2a0] ss:$28 sps:$4 sm:$0xff]  }
  0x88   :  { %570 = vmatpush1.bf16.msra.mxu0 %v2613_v30  ;;  %v2729_v27 = vld [vmem:[#allocation10 + $0x2dc] ss:$28 sps:$4 sm:$0xff]   ;;  %v3203_v30 = vshrl.u32 %v218_v29, 7 }
  0x89   :  { %321 = vmatpush1.bf16.msra.mxu1 %v2597_v17  ;;  %571 = vmatprep.subr.bf16.mxu0 %v2618_v31  ;;  %v2699_v17 = vld [vmem:[#allocation10 + $0x1c4] ss:$28 sps:$4 sm:$0xff]   ;;  %v2727_v28 = vld [vmem:[#allocation10 + $0x2d8] ss:$28 sps:$4 sm:$0xff]  }
  0x8a   :  { %322 = vmatprep.subr.bf16.mxu1 %v2598_v18  ;;  %v2697_v18 = vld [vmem:[#allocation10 + $0x1c0] ss:$28 sps:$4 sm:$0xff]   ;;  %v3206_v31 = vsub.s32 0, %v3203_v30 }
  0x8c   :  { %572 = vmatpush1.bf16.msra.mxu0 %v2616_v32  ;;  %v216_v32 = vld [vmem:[%s3278_s4] sm:$0x3] }
  0x8d   :  { %323 = vmatpush1.bf16.msra.mxu1 %v2600_v19  ;;  %573 = vmatprep.subr.bf16.mxu0 %v2621_v33  ;;  %v2705_v19 = vld [vmem:[#allocation10 + $0x1fc] ss:$28 sps:$4 sm:$0xff]   ;;  %v3212_v33 = vsub.s32 1, %v3203_v30 }
  0x8e   :  { %1351 = vmatprep.subr.bf16.mxu1 %v2651_v1  ;;  %v2694_v1 = vld [vmem:[#allocation10 + $0x190] ss:$28 sps:$4 sm:$0xff]  }
  0x90   :  { %574 = vmatpush1.bf16.msra.mxu0 %v2619_v34  ;;  %v221_v34 = vrot.slane %v216_v32, %v3206_v31 }
  0x91   :  { %575 = vmatprep.subr.bf16.mxu0 %v2624_v35  ;;  %v225_v35 = vrot.slane %v216_v32, %v3212_v33 }
  0x94   :  { %576 = vmatpush1.bf16.msra.mxu0 %v2622_v36 }
  0x95   :  { %577 = vmatprep.subr.bf16.mxu0 %v2627_v37 }
  0x98   :  { %578 = vmatpush1.bf16.msra.mxu0 %v2625_v38 }
  0x99   :  { %579 = vmatprep.subr.bf16.mxu0 %v2630_v39 }
  0x9c   :  { %580 = vmatpush1.bf16.msra.mxu0 %v2628_v40 }
  0x9d   :  { %581 = vmatprep.subr.bf16.mxu0 %v2633_v41 }
  0xa0   :  { %582 = vmatpush1.bf16.msra.mxu0 %v2631_v42 }
  0xa1   :  { %583 = vmatprep.subr.bf16.mxu0 %v2636_v43 }
  0xa4   :  { %584 = vmatpush1.bf16.msra.mxu0 %v2634_v44 }
  0xa5   :  { %585 = vmatprep.subr.bf16.mxu0 %v2639_v45 }
  0xa8   :  { %586 = vmatpush1.bf16.msra.mxu0 %v2637_v46 }
  0xa9   :  { %587 = vmatprep.subr.bf16.mxu0 %v2642_v47 }
  0xac   :  { %588 = vmatpush1.bf16.msra.mxu0 %v2640_v48 }
  0xad   :  { %589 = vmatprep.subr.bf16.mxu0 %v2645_v59  ;;  %v2684_v59 = vld [vmem:[#allocation10 + $0x124] ss:$28 sps:$4 sm:$0xff]  }
  0xb0   :  { %590 = vmatpush1.bf16.msra.mxu0 %v2643_v60  ;;  %v2682_v60 = vld [vmem:[#allocation10 + $0x120] ss:$28 sps:$4 sm:$0xff]  }
  0xb1   :  { %591 = vmatprep.subr.bf16.mxu0 %v2648_v61  ;;  %v2690_v61 = vld [vmem:[#allocation10 + $0x15c] ss:$28 sps:$4 sm:$0xff]  }
  0xb4   :  { %592 = vmatpush1.bf16.msra.mxu0 %v2646_v62  ;;  %v2688_v62 = vld [vmem:[#allocation10 + $0x158] ss:$28 sps:$4 sm:$0xff]  }
  0xb5   :  { %1394 = vmatprep.subr.bf16.mxu0 %v2654_v2  ;;  %v2702_v2 = vld [vmem:[#allocation10 + $0x1cc] ss:$28 sps:$4 sm:$0xff]  }
 0x14a   :  { %v190_v50 = vpop.f32.mrb[0].mxu0 }
 0x14b   :  { %v191_v51 = vadd.f32 %v2199_v49, %v190_v50  ;;  %v2536_v52 = vpop.f32.mrb[1].mxu0  ;;  %v2652_v50 = vld [vmem:[#allocation10 + $0x8] ss:$28 sps:$4 sm:$0xff]  }
 0x14c   :  { %v193_v53 = vpop.f32.mrb[2].mxu0  ;;  %v2658_v52 = vld [vmem:[#allocation10 + $0x40] ss:$28 sps:$4 sm:$0xff]  }
 0x14d   :  { %v194_v54 = vadd.f32 %v2199_v49, %v193_v53  ;;  %v2537_v55 = vpop.f32.mrb[3].mxu0  ;;  %v197_v56 = vmax.f32 %v191_v51, 0.0  ;;  %v2660_v51 = vld [vmem:[#allocation10 + $0x44] ss:$28 sps:$4 sm:$0xff]   ;;  %v2666_v53 = vld [vmem:[#allocation10 + $0x7c] ss:$28 sps:$4 sm:$0xff]  }
 0x14e   :  { %v2672_v55 = vld [vmem:[#allocation10 + $0xb4] ss:$28 sps:$4 sm:$0xff]  }
 0x14f   :  { %v198_v57 = vmax.f32 %v194_v54, 0.0  ;;  %v2664_v54 = vld [vmem:[#allocation10 + $0x78] ss:$28 sps:$4 sm:$0xff]  }
 0x151   :  { %v199_v58 = vpack.c.bf16 %v198_v57, %v197_v56  ;;  %v2670_v56 = vld [vmem:[#allocation10 + $0xb0] ss:$28 sps:$4 sm:$0xff]  }
 0x152   :  { %v2678_v57 = vld [vmem:[#allocation10 + $0xec] ss:$28 sps:$4 sm:$0xff]  }
 0x153   :  { %341 = vmatmul.mubr.bf16.vlgmr.msra.gmra.mrb[0].mxu1 %v199_v58  ;;  %v2676_v58 = vld [vmem:[#allocation10 + $0xe8] ss:$28 sps:$4 sm:$0xff]  }
 0x154   :  { %1352 = vmatpush1.bf16.msra.mxu1 %v2649_v63  ;;  %v2696_v63 = vld [vmem:[#allocation10 + $0x194] ss:$28 sps:$4 sm:$0xff]  }
 0x155   :  { %1353 = vmatprep.subr.bf16.mxu1 %v2657_v3  ;;  %v2700_v3 = vld [vmem:[#allocation10 + $0x1c8] ss:$28 sps:$4 sm:$0xff]  }
 0x158   :  { %1354 = vmatpush1.bf16.msra.mxu1 %v2655_v4  ;;  %v2708_v4 = vld [vmem:[#allocation10 + $0x204] ss:$28 sps:$4 sm:$0xff]  }
 0x159   :  { %1355 = vmatprep.subr.bf16.mxu1 %v2663_v5  ;;  %v2706_v5 = vld [vmem:[#allocation10 + $0x200] ss:$28 sps:$4 sm:$0xff]  }
 0x15c   :  { %1356 = vmatpush1.bf16.msra.mxu1 %v2661_v6  ;;  %v2714_v6 = vld [vmem:[#allocation10 + $0x23c] ss:$28 sps:$4 sm:$0xff]  }
 0x15d   :  { %1357 = vmatprep.subr.bf16.mxu1 %v2669_v7  ;;  %v2712_v7 = vld [vmem:[#allocation10 + $0x238] ss:$28 sps:$4 sm:$0xff]  }
 0x160   :  { %1358 = vmatpush1.bf16.msra.mxu1 %v2667_v8  ;;  %v2720_v8 = vld [vmem:[#allocation10 + $0x274] ss:$28 sps:$4 sm:$0xff]  }
 0x161   :  { %1359 = vmatprep.subr.bf16.mxu1 %v2675_v9  ;;  %v2718_v9 = vld [vmem:[#allocation10 + $0x270] ss:$28 sps:$4 sm:$0xff]  }
 0x164   :  { %1360 = vmatpush1.bf16.msra.mxu1 %v2673_v10  ;;  %v2726_v10 = vld [vmem:[#allocation10 + $0x2ac] ss:$28 sps:$4 sm:$0xff]  }
 0x165   :  { %1361 = vmatprep.subr.bf16.mxu1 %v2681_v11  ;;  %v2724_v11 = vld [vmem:[#allocation10 + $0x2a8] ss:$28 sps:$4 sm:$0xff]  }
 0x168   :  { %1362 = vmatpush1.bf16.msra.mxu1 %v2679_v12  ;;  %v2732_v12 = vld [vmem:[#allocation10 + $0x2e4] ss:$28 sps:$4 sm:$0xff]  }
 0x169   :  { %1363 = vmatprep.subr.bf16.mxu1 %v2687_v13  ;;  %v2730_v13 = vld [vmem:[#allocation10 + $0x2e0] ss:$28 sps:$4 sm:$0xff]  }
 0x16c   :  { %1364 = vmatpush1.bf16.msra.mxu1 %v2685_v14  ;;  %v2735_v14 = vld [vmem:[#allocation10 + $0x314] ss:$28 sps:$4 sm:$0xff]  }
 0x16d   :  { %1365 = vmatprep.subr.bf16.mxu1 %v2693_v15  ;;  %v2738_v15 = vld [vmem:[#allocation10 + $0x31c] ss:$28 sps:$4 sm:$0xff]  }
 0x170   :  { %1366 = vmatpush1.bf16.msra.mxu1 %v2691_v16  ;;  %v2733_v16 = vld [vmem:[#allocation10 + $0x310] ss:$28 sps:$4 sm:$0xff]  }
 0x171   :  { %1367 = vmatprep.subr.bf16.mxu1 %v2699_v17  ;;  %v2736_v17 = vld [vmem:[#allocation10 + $0x318] ss:$28 sps:$4 sm:$0xff]  }
 0x174   :  { %1368 = vmatpush1.bf16.msra.mxu1 %v2697_v18  ;;  %v2741_v18 = vld [vmem:[#allocation10 + $0x34c] ss:$28 sps:$4 sm:$0xff]  }
 0x175   :  { %1369 = vmatprep.subr.bf16.mxu1 %v2705_v19  ;;  %v2744_v19 = vld [vmem:[#allocation10 + $0x354] ss:$28 sps:$4 sm:$0xff]  }
 0x178   :  { %1370 = vmatpush1.bf16.msra.mxu1 %v2703_v20  ;;  %v2739_v20 = vld [vmem:[#allocation10 + $0x348] ss:$28 sps:$4 sm:$0xff]  }
 0x179   :  { %1371 = vmatprep.subr.bf16.mxu1 %v2711_v21  ;;  %v2742_v21 = vld [vmem:[#allocation10 + $0x350] ss:$28 sps:$4 sm:$0xff]  }
 0x17c   :  { %1372 = vmatpush1.bf16.msra.mxu1 %v2709_v22  ;;  %v2747_v22 = vld [vmem:[#allocation10 + $0x14] ss:$28 sps:$4 sm:$0xff]  }
 0x17d   :  { %1373 = vmatprep.subr.bf16.mxu1 %v2717_v23  ;;  %v2748_v23 = vld [vmem:[#allocation10 + $0x1d8] ss:$28 sps:$4 sm:$0xff]  }
 0x180   :  { %1374 = vmatpush1.bf16.msra.mxu1 %v2715_v24  ;;  %v389_v24 = vld [vmem:[%s3280_s6] sm:$0x3] }
 0x181   :  { %1375 = vmatprep.subr.bf16.mxu1 %v2723_v25  ;;  %v394_v25 = vrot.slane %v389_v24, %v3206_v31 }
 0x184   :  { %1376 = vmatpush1.bf16.msra.mxu1 %v2721_v26  ;;  %v398_v26 = vrot.slane %v389_v24, %v3212_v33  ;;  %v2822_v24 = vld [vmem:[#allocation11 + $0xd8] sm:$0xff]  }
 0x185   :  { %1377 = vmatprep.subr.bf16.mxu1 %v2729_v27 }
 0x188   :  { %1378 = vmatpush1.bf16.msra.mxu1 %v2727_v28 }
 0x189   :  { %1379 = vmatprep.subr.bf16.mxu1 %v2735_v14  ;;  %v2812_v14 = vld [vmem:[#allocation11 + $0x80] sm:$0xff]  }
 0x18c   :  { %1380 = vmatpush1.bf16.msra.mxu1 %v2733_v16  ;;  %v2814_v16 = vld [vmem:[#allocation11 + $0xc8] sm:$0xff]  }
 0x18d   :  { %1381 = vmatprep.subr.bf16.mxu1 %v2741_v18  ;;  %v2816_v18 = vld [vmem:[#allocation11 + $0x88] sm:$0xff]  }
 0x190   :  { %1382 = vmatpush1.bf16.msra.mxu1 %v2739_v20  ;;  %v2818_v20 = vld [vmem:[#allocation11 + $0xd0] sm:$0xff]  }
 0x191   :  { %1437 = vmatprep.subr.bf16.mxu1 %v2747_v22  ;;  %v2820_v22 = vld [vmem:[#allocation11 + $0x90] sm:$0xff]  }
 0x226   :  { %v342_v36 = vpop.f32.mrb[0].mxu1 }
 0x227   :  { %v343_v37 = vadd.f32 %v342_v36, %v221_v34  ;;  %v344_v38 = vpop.f32.mrb[1].mxu1 }
 0x228   :  { %v345_v39 = vadd.f32 %v344_v38, %v225_v35  ;;  %v346_v40 = vpop.f32.mrb[2].mxu1 }
 0x229   :  { %v347_v41 = vadd.f32 %v346_v40, %v221_v34  ;;  %v348_v42 = vpop.f32.mrb[3].mxu1  ;;  %v351_v44 = vmax.f32 %v343_v37, 0.0 }
 0x22a   :  { %v349_v43 = vadd.f32 %v348_v42, %v225_v35  ;;  %v352_v46 = vmax.f32 %v345_v39, 0.0 }
 0x22b   :  { %v353_v45 = vmax.f32 %v347_v41, 0.0 }
 0x22c   :  { %v354_v47 = vmax.f32 %v349_v43, 0.0 }
 0x22d   :  { %v355_v48 = vpack.c.bf16 %v353_v45, %v351_v44  ;;  %v2745_v44 = vld [vmem:[#allocation10 + $0x10] ss:$28 sps:$4 sm:$0xff]   ;;  %v2749_v45 = vld [vmem:[#allocation10 + $0x18] ss:$28 sps:$4 sm:$0xff]  }
 0x22e   :  { %v356_v49 = vpack.c.bf16 %v354_v47, %v352_v46  ;;  %v2752_v46 = vld [vmem:[#allocation10 + $0x4c] ss:$28 sps:$4 sm:$0xff]  }
 0x22f   :  { %v2753_v47 = vld [vmem:[#allocation10 + $0x210] ss:$28 sps:$4 sm:$0xff]  }
 0x230   :  { %593 = vmatprep.mubr.bf16.mxu0 %v356_v49  ;;  %v2754_v49 = vld [vmem:[#allocation10 + $0x50] ss:$28 sps:$4 sm:$0xff]  }
 0x231   :  { %594 = vmatmul.mubr.bf16.vlgmr.msra.gmra.mrb[4].mxu0 %v355_v48  ;;  %v2750_v48 = vld [vmem:[#allocation10 + $0x48] ss:$28 sps:$4 sm:$0xff]  }
 0x232   :  { %1395 = vmatpush1.bf16.msra.mxu0 %v2652_v50  ;;  %v2757_v50 = vld [vmem:[#allocation10 + $0x84] ss:$28 sps:$4 sm:$0xff]  }
 0x233   :  { %1396 = vmatprep.subr.bf16.mxu0 %v2660_v51  ;;  %v2758_v51 = vld [vmem:[#allocation10 + $0x248] ss:$28 sps:$4 sm:$0xff]  }
 0x236   :  { %1397 = vmatpush1.bf16.msra.mxu0 %v2658_v52  ;;  %v2755_v52 = vld [vmem:[#allocation10 + $0x80] ss:$28 sps:$4 sm:$0xff]  }
 0x237   :  { %1398 = vmatprep.subr.bf16.mxu0 %v2666_v53  ;;  %v2759_v53 = vld [vmem:[#allocation10 + $0x88] ss:$28 sps:$4 sm:$0xff]  }
 0x23a   :  { %1399 = vmatpush1.bf16.msra.mxu0 %v2664_v54  ;;  %v2762_v54 = vld [vmem:[#allocation10 + $0xbc] ss:$28 sps:$4 sm:$0xff]  }
 0x23b   :  { %1400 = vmatprep.subr.bf16.mxu0 %v2672_v55  ;;  %v2763_v55 = vld [vmem:[#allocation10 + $0x280] ss:$28 sps:$4 sm:$0xff]  }
 0x23e   :  { %1401 = vmatpush1.bf16.msra.mxu0 %v2670_v56  ;;  %v2760_v56 = vld [vmem:[#allocation10 + $0xb8] ss:$28 sps:$4 sm:$0xff]  }
 0x23f   :  { %1402 = vmatprep.subr.bf16.mxu0 %v2678_v57  ;;  %v2764_v57 = vld [vmem:[#allocation10 + $0xc0] ss:$28 sps:$4 sm:$0xff]  }
 0x242   :  { %1403 = vmatpush1.bf16.msra.mxu0 %v2676_v58  ;;  %v2767_v58 = vld [vmem:[#allocation10 + $0xf4] ss:$28 sps:$4 sm:$0xff]  }
 0x243   :  { %1404 = vmatprep.subr.bf16.mxu0 %v2684_v59  ;;  %v2768_v59 = vld [vmem:[#allocation10 + $0x2b8] ss:$28 sps:$4 sm:$0xff]  }
 0x246   :  { %1405 = vmatpush1.bf16.msra.mxu0 %v2682_v60  ;;  %v2765_v60 = vld [vmem:[#allocation10 + $0xf0] ss:$28 sps:$4 sm:$0xff]  }
 0x247   :  { %1406 = vmatprep.subr.bf16.mxu0 %v2690_v61  ;;  %v2769_v61 = vld [vmem:[#allocation10 + $0xf8] ss:$28 sps:$4 sm:$0xff]  }
 0x24a   :  { %1407 = vmatpush1.bf16.msra.mxu0 %v2688_v62  ;;  %v2772_v62 = vld [vmem:[#allocation10 + $0x12c] ss:$28 sps:$4 sm:$0xff]  }
 0x24b   :  { %1408 = vmatprep.subr.bf16.mxu0 %v2696_v63  ;;  %v2773_v63 = vld [vmem:[#allocation10 + $0x2f0] ss:$28 sps:$4 sm:$0xff]  }
 0x24e   :  { %1409 = vmatpush1.bf16.msra.mxu0 %v2694_v1  ;;  %v2770_v1 = vld [vmem:[#allocation10 + $0x128] ss:$28 sps:$4 sm:$0xff]  }
 0x24f   :  { %1410 = vmatprep.subr.bf16.mxu0 %v2702_v2  ;;  %v2774_v2 = vld [vmem:[#allocation10 + $0x130] ss:$28 sps:$4 sm:$0xff]  }
 0x252   :  { %1411 = vmatpush1.bf16.msra.mxu0 %v2700_v3  ;;  %v2777_v3 = vld [vmem:[#allocation10 + $0x164] ss:$28 sps:$4 sm:$0xff]  }
 0x253   :  { %1412 = vmatprep.subr.bf16.mxu0 %v2708_v4  ;;  %v2778_v4 = vld [vmem:[#allocation10 + $0x328] ss:$28 sps:$4 sm:$0xff]  }
 0x256   :  { %1413 = vmatpush1.bf16.msra.mxu0 %v2706_v5  ;;  %v2775_v5 = vld [vmem:[#allocation10 + $0x160] ss:$28 sps:$4 sm:$0xff]  }
 0x257   :  { %1414 = vmatprep.subr.bf16.mxu0 %v2714_v6  ;;  %v2779_v6 = vld [vmem:[#allocation10 + $0x168] ss:$28 sps:$4 sm:$0xff]  }
 0x25a   :  { %1415 = vmatpush1.bf16.msra.mxu0 %v2712_v7  ;;  %v2782_v7 = vld [vmem:[#allocation10 + $0x19c] ss:$28 sps:$4 sm:$0xff]  }
 0x25b   :  { %1416 = vmatprep.subr.bf16.mxu0 %v2720_v8  ;;  %v2783_v8 = vld [vmem:[#allocation10 + $0x360] ss:$28 sps:$4 sm:$0xff]  }
 0x25e   :  { %1417 = vmatpush1.bf16.msra.mxu0 %v2718_v9  ;;  %v2780_v9 = vld [vmem:[#allocation10 + $0x198] ss:$28 sps:$4 sm:$0xff]  }
 0x25f   :  { %1418 = vmatprep.subr.bf16.mxu0 %v2726_v10  ;;  %v2784_v10 = vld [vmem:[#allocation10 + $0x1a0] ss:$28 sps:$4 sm:$0xff]  }
 0x262   :  { %1419 = vmatpush1.bf16.msra.mxu0 %v2724_v11  ;;  %v2787_v11 = vld [vmem:[#allocation10 + $0x1d4] ss:$28 sps:$4 sm:$0xff]  }
 0x263   :  { %1420 = vmatprep.subr.bf16.mxu0 %v2732_v12  ;;  %v2810_v12 = vld [vmem:[#allocation11 + $0xc0] sm:$0xff]  }
 0x266   :  { %1421 = vmatpush1.bf16.msra.mxu0 %v2730_v13  ;;  %v2785_v13 = vld [vmem:[#allocation10 + $0x1d0] ss:$28 sps:$4 sm:$0xff]  }
 0x267   :  { %1422 = vmatprep.subr.bf16.mxu0 %v2738_v15  ;;  %v2790_v15 = vld [vmem:[#allocation10 + $0x20c] ss:$28 sps:$4 sm:$0xff]  }
 0x26a   :  { %1423 = vmatpush1.bf16.msra.mxu0 %v2736_v17  ;;  %v2788_v17 = vld [vmem:[#allocation10 + $0x208] ss:$28 sps:$4 sm:$0xff]  }
 0x26b   :  { %1424 = vmatprep.subr.bf16.mxu0 %v2744_v19  ;;  %v2793_v19 = vld [vmem:[#allocation10 + $0x244] ss:$28 sps:$4 sm:$0xff]  }
 0x26e   :  { %1425 = vmatpush1.bf16.msra.mxu0 %v2742_v21  ;;  %v2791_v21 = vld [vmem:[#allocation10 + $0x240] ss:$28 sps:$4 sm:$0xff]  }
 0x26f   :  { %2433 = vmatprep.subr.bf16.mxu0 %v2748_v23  ;;  %v2796_v23 = vld [vmem:[#allocation10 + $0x27c] ss:$28 sps:$4 sm:$0xff]  }
 0x304   :  { %v595_v27 = vpop.f32.mrb[4].mxu0 }
 0x305   :  { %v596_v28 = vadd.f32 %v595_v27, %v394_v25  ;;  %v597_v29 = vpop.f32.mrb[5].mxu0  ;;  %v2799_v27 = vld [vmem:[#allocation10 + $0x2b4] ss:$28 sps:$4 sm:$0xff]  }
 0x306   :  { %v598_v32 = vadd.f32 %v597_v29, %v398_v26  ;;  %v599_v34 = vpop.f32.mrb[6].mxu0  ;;  %v2797_v29 = vld [vmem:[#allocation10 + $0x2b0] ss:$28 sps:$4 sm:$0xff]  }
 0x307   :  { %v600_v35 = vadd.f32 %v599_v34, %v394_v25  ;;  %v601_v36 = vpop.f32.mrb[7].mxu0  ;;  %v604_v38 = vmax.f32 %v596_v28, 0.0  ;;  %v2794_v25 = vld [vmem:[#allocation10 + $0x278] ss:$28 sps:$4 sm:$0xff]   ;;  %v2826_v28 = vld [vmem:[#allocation11 + $0xe0] sm:$0xff]  }
 0x308   :  { %v602_v37 = vadd.f32 %v601_v36, %v398_v26  ;;  %v605_v40 = vmax.f32 %v598_v32, 0.0  ;;  %v2824_v26 = vld [vmem:[#allocation11 + $0x98] sm:$0xff]   ;;  %v2828_v32 = vld [vmem:[#allocation11 + $0xa0] sm:$0xff]   ;;  %v2802_v34 = vld [vmem:[#allocation10 + $0x2ec] ss:$28 sps:$4 sm:$0xff]  }
 0x309   :  { %v606_v39 = vmax.f32 %v600_v35, 0.0  ;;  %v2830_v35 = vld [vmem:[#allocation11 + $0xe8] sm:$0xff]  }
 0x30a   :  { %v607_v41 = vmax.f32 %v602_v37, 0.0  ;;  %v2800_v36 = vld [vmem:[#allocation10 + $0x2e8] ss:$28 sps:$4 sm:$0xff]  }
 0x30b   :  { %v3221_v42 = vpack.c.bf16 %v606_v39, %v604_v38  ;;  %v2805_v37 = vld [vmem:[#allocation10 + $0x324] ss:$28 sps:$4 sm:$0xff]   ;;  %v2808_v39 = vld [vmem:[#allocation10 + $0x35c] ss:$28 sps:$4 sm:$0xff]  }
 0x30c   :  { %v609_v43 = vpack.c.bf16 %v607_v41, %v605_v40  ;;  %v2803_v38 = vld [vmem:[#allocation10 + $0x320] ss:$28 sps:$4 sm:$0xff]   ;;  %v2806_v40 = vld [vmem:[#allocation10 + $0x358] ss:$28 sps:$4 sm:$0xff]  }
 0x30d   :  { %v2809_v41 = vld [vmem:[#allocation11 + $0x40] sm:$0xff]  }
 0x30e   :  { %1383 = vmatprep.mubr.bf16.mxu1 %v609_v43  ;;  %1426 = vmatprep.mubr.bf16.mxu0 %v609_v43 }
 0x30f   :  { %1384 = vmatmul.mubr.bf16.vlgmr.msra.gmra.mrb[4].mxu1 %v3221_v42  ;;  %1427 = vmatmul.mubr.bf16.vlgmr.msra.gmra.mrb[8].mxu0 %v3221_v42 }
 0x310   :  { %1438 = vmatpush1.bf16.msra.mxu1 %v2745_v44  ;;  %2434 = vmatpush3.bf16.msra.mxu0 %v2749_v45  ;;  %v2813_v44 = vld [vmem:[#allocation11 + $0x48] sm:$0xff]  }
 0x311   :  { %1469 = vmatprep.mubr.bf16.mxu1 %v609_v43  ;;  %1512 = vmatprep.mubr.bf16.mxu0 %v609_v43  ;;  %v2811_v43 = vld [vmem:[#allocation11] sm:$0xff]   ;;  %v2815_v45 = vld [vmem:[#allocation11 + $0x8] sm:$0xff]  }
 0x312   :  { %1439 = vmatprep.subr.bf16.mxu1 %v2752_v46  ;;  %2435 = vmatprep.subr.bf16.mxu0 %v2753_v47  ;;  %v2817_v46 = vld [vmem:[#allocation11 + $0x50] sm:$0xff]  }
 0x313   :  { %v2819_v47 = vld [vmem:[#allocation11 + $0x10] sm:$0xff]  }
 0x314   :  { %1440 = vmatpush1.bf16.msra.mxu1 %v2750_v48  ;;  %2436 = vmatpush3.bf16.msra.mxu0 %v2754_v49  ;;  %v2821_v48 = vld [vmem:[#allocation11 + $0x58] sm:$0xff]  }
 0x315   :  { %1441 = vmatprep.subr.bf16.mxu1 %v2757_v50  ;;  %2437 = vmatprep.subr.bf16.mxu0 %v2758_v51  ;;  %v2823_v49 = vld [vmem:[#allocation11 + $0x18] sm:$0xff]   ;;  %v2825_v50 = vld [vmem:[#allocation11 + $0x60] sm:$0xff]  }
 0x316   :  { %v2827_v51 = vld [vmem:[#allocation11 + $0x20] sm:$0xff]  }
 0x318   :  { %1442 = vmatpush1.bf16.msra.mxu1 %v2755_v52  ;;  %2438 = vmatpush3.bf16.msra.mxu0 %v2759_v53  ;;  %v2829_v52 = vld [vmem:[#allocation11 + $0x68] sm:$0xff]  }
 0x319   :  { %1443 = vmatprep.subr.bf16.mxu1 %v2762_v54  ;;  %2439 = vmatprep.subr.bf16.mxu0 %v2763_v55  ;;  %v2831_v53 = vld [vmem:[#allocation11 + $0x28] sm:$0xff]   ;;  %v2833_v54 = vld [vmem:[#allocation11 + $0x70] sm:$0xff]  }
 0x31a   :  { %v2834_v55 = vld [vmem:[#allocation11 + $0xf0] sm:$0xff]  }
 0x31c   :  { %1444 = vmatpush1.bf16.msra.mxu1 %v2760_v56  ;;  %2440 = vmatpush3.bf16.msra.mxu0 %v2764_v57  ;;  %v2835_v56 = vld [vmem:[#allocation11 + $0x30] sm:$0xff]  }
 0x31d   :  { %1445 = vmatprep.subr.bf16.mxu1 %v2767_v58  ;;  %2441 = vmatprep.subr.bf16.mxu0 %v2768_v59  ;;  %v2836_v57 = vld [vmem:[#allocation11 + $0xb0] sm:$0xff]   ;;  %v2837_v58 = vld [vmem:[#allocation11 + $0x78] sm:$0xff]  }
 0x31e   :  { %v2838_v59 = vld [vmem:[#allocation11 + $0xf8] sm:$0xff]  }
 0x320   :  { %1446 = vmatpush1.bf16.msra.mxu1 %v2765_v60  ;;  %2442 = vmatpush3.bf16.msra.mxu0 %v2769_v61  ;;  %v2839_v60 = vld [vmem:[#allocation11 + $0x38] sm:$0xff]  }
 0x321   :  { %1447 = vmatprep.subr.bf16.mxu1 %v2772_v62  ;;  %2443 = vmatprep.subr.bf16.mxu0 %v2773_v63  ;;  %v2840_v61 = vld [vmem:[#allocation11 + $0xb8] sm:$0xff]   ;;  %v2849_v62 = vld [vmem:[#allocation11 + $0x140] sm:$0xff]   ;;  %v750_v63 = vsub.s32 2, %v3203_v30 }
 0x324   :  { %1448 = vmatpush1.bf16.msra.mxu1 %v2770_v1  ;;  %2444 = vmatpush3.bf16.msra.mxu0 %v2774_v2  ;;  %v3232_v1 = vld [vmem:[%s3282_s8] sm:$0xff]  ;;  %v754_v2 = vsub.s32 3, %v3203_v30 }
 0x325   :  { %1449 = vmatprep.subr.bf16.mxu1 %v2777_v3  ;;  %2445 = vmatprep.subr.bf16.mxu0 %v2778_v4  ;;  %v743_v3 = vrot.slane %v3232_v1, %v3206_v31  ;;  %v751_v4 = vrot.slane %v3232_v1, %v750_v63 }
 0x328   :  { %1450 = vmatpush1.bf16.msra.mxu1 %v2775_v5  ;;  %2446 = vmatpush3.bf16.msra.mxu0 %v2779_v6  ;;  %v747_v5 = vrot.slane %v3232_v1, %v3212_v33  ;;  %v755_v6 = vrot.slane %v3232_v1, %v754_v2 }
 0x329   :  { %1451 = vmatprep.subr.bf16.mxu1 %v2782_v7  ;;  %2447 = vmatprep.subr.bf16.mxu0 %v2783_v8 }
 0x32c   :  { %1452 = vmatpush1.bf16.msra.mxu1 %v2780_v9  ;;  %2448 = vmatpush3.bf16.msra.mxu0 %v2784_v10 }
 0x32d   :  { %1453 = vmatprep.subr.bf16.mxu1 %v2787_v11  ;;  %2477 = vmatprep.subr.bf16.mxu0 %v2810_v12 }
 0x32f   :  { %1513 = vmatmul.mubr.bf16.vlgmr.msra.gmra.mrb[12].mxu0 %v3221_v42 }
 0x330   :  { %1454 = vmatpush1.bf16.msra.mxu1 %v2785_v13  ;;  %2478 = vmatpush3.bf16.msra.mxu0 %v2812_v14 }
 0x331   :  { %1455 = vmatprep.subr.bf16.mxu1 %v2790_v15  ;;  %2479 = vmatprep.subr.bf16.mxu0 %v2814_v16 }
 0x334   :  { %1456 = vmatpush1.bf16.msra.mxu1 %v2788_v17  ;;  %2480 = vmatpush3.bf16.msra.mxu0 %v2816_v18 }
 0x335   :  { %1457 = vmatprep.subr.bf16.mxu1 %v2793_v19  ;;  %2481 = vmatprep.subr.bf16.mxu0 %v2818_v20 }
 0x338   :  { %1458 = vmatpush1.bf16.msra.mxu1 %v2791_v21  ;;  %2482 = vmatpush3.bf16.msra.mxu0 %v2820_v22 }
 0x339   :  { %1459 = vmatprep.subr.bf16.mxu1 %v2796_v23  ;;  %2483 = vmatprep.subr.bf16.mxu0 %v2822_v24 }
 0x33c   :  { %1460 = vmatpush1.bf16.msra.mxu1 %v2794_v25  ;;  %2484 = vmatpush3.bf16.msra.mxu0 %v2824_v26 }
 0x33d   :  { %1461 = vmatprep.subr.bf16.mxu1 %v2799_v27  ;;  %2485 = vmatprep.subr.bf16.mxu0 %v2826_v28 }
 0x340   :  { %1462 = vmatpush1.bf16.msra.mxu1 %v2797_v29  ;;  %2486 = vmatpush3.bf16.msra.mxu0 %v2828_v32 }
 0x341   :  { %1463 = vmatprep.subr.bf16.mxu1 %v2802_v34  ;;  %2487 = vmatprep.subr.bf16.mxu0 %v2830_v35 }
 0x344   :  { %1464 = vmatpush1.bf16.msra.mxu1 %v2800_v36  ;;  %v2841_v36 = vld [vmem:[#allocation11 + $0x180] sm:$0xff]  }
 0x345   :  { %1465 = vmatprep.subr.bf16.mxu1 %v2805_v37  ;;  %v2850_v37 = vld [vmem:[#allocation11 + $0x100] sm:$0xff]  }
 0x348   :  { %1466 = vmatpush1.bf16.msra.mxu1 %v2803_v38  ;;  %v2851_v38 = vld [vmem:[#allocation11 + $0x148] sm:$0xff]  }
 0x349   :  { %1467 = vmatprep.subr.bf16.mxu1 %v2808_v39  ;;  %v2842_v39 = vld [vmem:[#allocation11 + $0x188] sm:$0xff]  }
 0x34c   :  { %1468 = vmatpush1.bf16.msra.mxu1 %v2806_v40  ;;  %v2852_v40 = vld [vmem:[#allocation11 + $0x108] sm:$0xff]  }
 0x34d   :  { %2455 = vmatprep.subr.bf16.mxu1 %v2809_v41  ;;  %v2853_v41 = vld [vmem:[#allocation11 + $0x150] sm:$0xff]  }
 0x34f   :  { %1470 = vmatmul.mubr.bf16.vlgmr.msra.gmra.mrb[8].mxu1 %v3221_v42  ;;  %v2832_v42 = vld [vmem:[#allocation11 + $0xa8] sm:$0xff]  }
 0x350   :  { %2456 = vmatpush3.bf16.msra.mxu1 %v2811_v43  ;;  %2488 = vmatpush3.bf16.msra.mxu0 %v2832_v42  ;;  %v2843_v43 = vld [vmem:[#allocation11 + $0x190] sm:$0xff]   ;;  %v2860_v42 = vld [vmem:[#allocation11 + $0x128] sm:$0xff]  }
 0x351   :  { %2457 = vmatprep.subr.bf16.mxu1 %v2813_v44  ;;  %2489 = vmatprep.subr.bf16.mxu0 %v2834_v55  ;;  %v2854_v44 = vld [vmem:[#allocation11 + $0x110] sm:$0xff]  }
 0x354   :  { %2458 = vmatpush3.bf16.msra.mxu1 %v2815_v45  ;;  %2490 = vmatpush3.bf16.msra.mxu0 %v2836_v57  ;;  %v2855_v45 = vld [vmem:[#allocation11 + $0x158] sm:$0xff]   ;;  %v2847_v57 = vld [vmem:[#allocation11 + $0x1b0] sm:$0xff]  }
 0x355   :  { %2459 = vmatprep.subr.bf16.mxu1 %v2817_v46  ;;  %2491 = vmatprep.subr.bf16.mxu0 %v2838_v59  ;;  %v2844_v46 = vld [vmem:[#allocation11 + $0x198] sm:$0xff]   ;;  %v2862_v59 = vld [vmem:[#allocation11 + $0x130] sm:$0xff]  }
 0x358   :  { %2460 = vmatpush3.bf16.msra.mxu1 %v2819_v47  ;;  %2492 = vmatpush3.bf16.msra.mxu0 %v2840_v61  ;;  %v2856_v47 = vld [vmem:[#allocation11 + $0x118] sm:$0xff]  }
 0x359   :  { %2461 = vmatprep.subr.bf16.mxu1 %v2821_v48  ;;  %2538 = vmatprep.subr.bf16.mxu0 %v3045_v0  ;;  %v2857_v48 = vld [vmem:[#allocation11 + $0x160] sm:$0xff]  }
 0x35c   :  { %2462 = vmatpush3.bf16.msra.mxu1 %v2823_v49  ;;  %v2845_v49 = vld [vmem:[#allocation11 + $0x1a0] sm:$0xff]  }
 0x35d   :  { %2463 = vmatprep.subr.bf16.mxu1 %v2825_v50  ;;  %v2858_v50 = vld [vmem:[#allocation11 + $0x120] sm:$0xff]  }
 0x360   :  { %2464 = vmatpush3.bf16.msra.mxu1 %v2827_v51  ;;  %v2859_v51 = vld [vmem:[#allocation11 + $0x168] sm:$0xff]  }
 0x361   :  { %2465 = vmatprep.subr.bf16.mxu1 %v2829_v52  ;;  %v766_v52 = vsub.s32 6, %v3203_v30 }
 0x364   :  { %2466 = vmatpush3.bf16.msra.mxu1 %v2831_v53  ;;  %v2846_v53 = vld [vmem:[#allocation11 + $0x1a8] sm:$0xff]  }
 0x365   :  { %2467 = vmatprep.subr.bf16.mxu1 %v2833_v54  ;;  %v2861_v54 = vld [vmem:[#allocation11 + $0x170] sm:$0xff]  }
 0x368   :  { %2468 = vmatpush3.bf16.msra.mxu1 %v2835_v56  ;;  %v767_v56 = vrot.slane %v3232_v1, %v766_v52 }
 0x369   :  { %2469 = vmatprep.subr.bf16.mxu1 %v2837_v58 }
 0x36c   :  { %2470 = vmatpush3.bf16.msra.mxu1 %v2839_v60 }
 0x36d   :  { %2499 = vmatprep.subr.bf16.mxu1 %v2849_v62  ;;  %v2863_v62 = vld [vmem:[#allocation11 + $0x178] sm:$0xff]  }
 0x3e2   :  { %v1385_v7 = vpop.f32.mrb[4].mxu1  ;;  %v1428_v8 = vpop.f32.mrb[8].mxu0 }
 0x3e3   :  { %v1386_v9 = vadd.f32 %v1385_v7, %v743_v3  ;;  %v1429_v10 = vadd.f32 %v1428_v8, %v751_v4  ;;  %v1387_v11 = vpop.f32.mrb[5].mxu1  ;;  %v1430_v12 = vpop.f32.mrb[9].mxu0 }
 0x3e4   :  { %v1388_v13 = vadd.f32 %v1387_v11, %v747_v5  ;;  %v1431_v14 = vadd.f32 %v1430_v12, %v755_v6  ;;  %v1389_v15 = vpop.f32.mrb[6].mxu1  ;;  %v1432_v16 = vpop.f32.mrb[10].mxu0  ;;  %v762_v11 = vsub.s32 5, %v3203_v30 }
 0x3e5   :  { %v1390_v17 = vadd.f32 %v1389_v15, %v743_v3  ;;  %v1433_v18 = vadd.f32 %v1432_v16, %v751_v4  ;;  %v1391_v31 = vpop.f32.mrb[7].mxu1  ;;  %v1434_v19 = vpop.f32.mrb[11].mxu0  ;;  %v1521_v22 = vmax.f32 %v1386_v9, 0.0  ;;  %v1523_v33 = vmax.f32 %v1429_v10, 0.0  ;;  %v2848_v4 = vld [vmem:[#allocation11 + $0x1b8] sm:$0xff]  }
 0x3e6   :  { %v1392_v20 = vadd.f32 %v1391_v31, %v747_v5  ;;  %v1435_v21 = vadd.f32 %v1434_v19, %v755_v6  ;;  %v1522_v25 = vmax.f32 %v1388_v13, 0.0  ;;  %v1524_v26 = vmax.f32 %v1431_v14, 0.0  ;;  %v2864_v5 = vld [vmem:[#allocation11 + $0x138] sm:$0xff]  }
 0x3e7   :  { %v1528_v23 = vmax.f32 %v1390_v17, 0.0  ;;  %v1530_v24 = vmax.f32 %v1433_v18, 0.0  ;;  %v758_v10 = vsub.s32 4, %v3203_v30  ;;  %v763_v13 = vrot.slane %v3232_v1, %v762_v11 }
 0x3e8   :  { %v1529_v27 = vmax.f32 %v1392_v20, 0.0  ;;  %v1531_v28 = vmax.f32 %v1435_v21, 0.0 }
 0x3e9   :  { %v1535_v29 = vpack.c.bf16 %v1528_v23, %v1521_v22  ;;  %v1537_v32 = vpack.c.bf16 %v1530_v24, %v1523_v33  ;;  %v759_v12 = vrot.slane %v3232_v1, %v758_v10  ;;  %v2364_v1 = vld [vmem:[%s3284_s10] ss:$0 sm:$0xff]  ;;  %s3048_s10 = smov [#allocation13]  }
 0x3ea   :  { %v1536_v34 = vpack.c.bf16 %v1529_v27, %v1522_v25  ;;  %v1538_v35 = vpack.c.bf16 %v1531_v28, %v1524_v26  ;;  %s2184_s26 = sshll.u32 %s3048_s10, 4  ;;  %s2185_s26 = int_to_ptr.vmem [resolvable:$true] %s2184_s26 }
 0x3eb   :  { %s3001_s3 = scalar_lea.vmem %s2185_s26, 128  ;;  %p3006_p7 = scmp.lt.s32.totalorder %s2185_s26, %s2185_s26 }
 0x3ec   :  { %2029 = vmatprep.mubr.bf16.mxu1 %v1536_v34  ;;  %2070 = vmatprep.mubr.bf16.mxu0 %v1538_v35  ;;  %p3002_p6 = scmp.ne.s32.totalorder %s2185_s26, %s3001_s3  ;;  %p3007_p8 = scmp.lt.s32.totalorder %s3001_s3, %s3001_s3 }
 0x3ed   :  { %2030 = vmatmul.mubr.bf16.vlgmr.msra.gmra.mrb[12].mxu1 %v1535_v29  ;;  %2071 = vmatmul.mubr.bf16.vlgmr.msra.gmra.mrb[16].mxu0 %v1537_v32 }
 0x3ee   :  { %2539 = vmatpush3.bf16.msra.mxu0 %v2841_v36  ;;  %2554 = vmatprep.mubr.msk.bf16.mxu0 %vm3046_vm0, %v3045_v0  ;;  %p3008_p9 = por %p3007_p8, %p3006_p7 }
 0x3ef   :  { %2540 = vmatprep.subr.bf16.mxu0 %v3045_v0  ;;  %2500 = vmatpush3.bf16.msra.mxu1 %v2850_v37 }
 0x3f0   :  { %2501 = vmatprep.subr.bf16.mxu1 %v2851_v38  ;;  %p3009_p10 = pnand %p3008_p9, %p3002_p6 }
 0x3f2   :  { %2541 = vmatpush3.bf16.msra.mxu0 %v2842_v39 }
 0x3f3   :  { %2542 = vmatprep.subr.bf16.mxu0 %v3045_v0  ;;  %2502 = vmatpush3.bf16.msra.mxu1 %v2852_v40 }
 0x3f4   :  { %2503 = vmatprep.subr.bf16.mxu1 %v2853_v41 }
 0x3f6   :  { %2543 = vmatpush3.bf16.msra.mxu0 %v2843_v43 }
 0x3f7   :  { %2544 = vmatprep.subr.bf16.mxu0 %v3045_v0  ;;  %2504 = vmatpush3.bf16.msra.mxu1 %v2854_v44 }
 0x3f8   :  { %2505 = vmatprep.subr.bf16.mxu1 %v2855_v45 }
 0x3fa   :  { %2545 = vmatpush3.bf16.msra.mxu0 %v2844_v46 }
 0x3fb   :  { %2546 = vmatprep.subr.bf16.mxu0 %v3045_v0  ;;  %2506 = vmatpush3.bf16.msra.mxu1 %v2856_v47 }
 0x3fc   :  { %2507 = vmatprep.subr.bf16.mxu1 %v2857_v48 }
 0x3fe   :  { %2547 = vmatpush3.bf16.msra.mxu0 %v2845_v49 }
 0x3ff   :  { %2548 = vmatprep.subr.bf16.mxu0 %v3045_v0  ;;  %2508 = vmatpush3.bf16.msra.mxu1 %v2858_v50 }
 0x400   :  { %2509 = vmatprep.subr.bf16.mxu1 %v2859_v51 }
 0x402   :  { %v2449_v55 = vpop.f32.mrb[12].mxu0  ;;  %2549 = vmatpush3.bf16.msra.mxu0 %v2846_v53 }
 0x403   :  { %v2450_v58 = vpop.f32.mrb[13].mxu0  ;;  %2550 = vmatprep.subr.bf16.mxu0 %v3045_v0  ;;  %2510 = vmatpush3.bf16.msra.mxu1 %v2860_v42 }
 0x404   :  { %v2451_v60 = vadd.f32 %v2450_v58, %v2449_v55  ;;  %v2452_v61 = vpop.f32.mrb[14].mxu0  ;;  %2511 = vmatprep.subr.bf16.mxu1 %v2861_v54 }
 0x405   :  { %v2453_v63 = vpop.f32.mrb[15].mxu0 }
 0x406   :  { %v1515_v2 = vadd.f32 %v2451_v60, %v767_v56  ;;  %v2454_v3 = vadd.f32 %v2453_v63, %v2452_v61  ;;  %2551 = vmatpush3.bf16.msra.mxu0 %v2847_v57 }
 0x407   :  { %2552 = vmatprep.subr.bf16.mxu0 %v3045_v0  ;;  %2512 = vmatpush3.bf16.msra.mxu1 %v2862_v59 }
 0x408   :  { %v1518_v6 = vadd.f32 %v2454_v3, %v767_v56  ;;  %2513 = vmatprep.subr.bf16.mxu1 %v2863_v62  ;;  %v1527_v7 = vmax.f32 %v1515_v2, 0.0 }
 0x40a   :  { %v1534_v8 = vmax.f32 %v1518_v6, 0.0  ;;  %2553 = vmatpush3.bf16.msra.mxu0 %v2848_v4 }
 0x40b   :  { %2514 = vmatpush3.bf16.msra.mxu1 %v2864_v5 }
 0x40c   :  { %v1541_v9 = vpack.c.bf16 %v1534_v8, %v1527_v7 }
 0x40e   :  { %2555 = vmatmul.mubr.bf16.vlgmr.msra.gmra.mrb[20].mxu0 %v1541_v9 }
 0x422   :  { %v1471_v14 = vpop.f32.mrb[8].mxu1 }
 0x423   :  { %v1472_v0 = vadd.f32 %v1471_v14, %v759_v12  ;;  %v1473_v15 = vpop.f32.mrb[9].mxu1 }
 0x424   :  { %v1474_v16 = vadd.f32 %v1473_v15, %v763_v13  ;;  %v1475_v17 = vpop.f32.mrb[10].mxu1 }
 0x425   :  { %v1476_v18 = vadd.f32 %v1475_v17, %v759_v12  ;;  %v1477_v31 = vpop.f32.mrb[11].mxu1  ;;  %v1525_v20 = vmax.f32 %v1472_v0, 0.0 }
 0x426   :  { %v1478_v19 = vadd.f32 %v1477_v31, %v763_v13  ;;  %v1526_v22 = vmax.f32 %v1474_v16, 0.0 }
 0x427   :  { %v1532_v21 = vmax.f32 %v1476_v18, 0.0 }
 0x428   :  { %v1533_v33 = vmax.f32 %v1478_v19, 0.0 }
 0x429   :  { %v1539_v23 = vpack.c.bf16 %v1532_v21, %v1525_v20 }
 0x42a   :  { %v1540_v24 = vpack.c.bf16 %v1533_v33, %v1526_v22 }
 0x42c   :  { %2111 = vmatprep.mubr.bf16.mxu1 %v1540_v24 }
 0x42d   :  { %2112 = vmatmul.mubr.bf16.vlgmr.msra.gmra.mrb[16].mxu1 %v1539_v23 }
 0x4c0   :  { %v2471_v30 = vpop.f32.mrb[12].mxu1  ;;  %v2493_v25 = vpop.f32.mrb[16].mxu0 }
 0x4c1   :  { %v2472_v26 = vpop.f32.mrb[13].mxu1  ;;  %v2494_v27 = vpop.f32.mrb[17].mxu0 }
 0x4c2   :  { %v2473_v28 = vadd.f32 %v2472_v26, %v2471_v30  ;;  %v2495_v29 = vadd.f32 %v2494_v27, %v2493_v25  ;;  %v2474_v32 = vpop.f32.mrb[14].mxu1  ;;  %v2496_v34 = vpop.f32.mrb[18].mxu0 }
 0x4c3   :  { %v2475_v35 = vpop.f32.mrb[15].mxu1  ;;  %v2497_v36 = vpop.f32.mrb[19].mxu0 }
 0x4c4   :  { %v2032_v37 = vadd.f32 %v2473_v28, %v2364_v1  ;;  %v2476_v38 = vadd.f32 %v2475_v35, %v2474_v32  ;;  %v2498_v39 = vadd.f32 %v2497_v36, %v2496_v34 }
 0x4c6   :  { %v2073_v40 = vadd.f32 %v2495_v29, %v2032_v37  ;;  %v2035_v41 = vadd.f32 %v2476_v38, %v2364_v1 }
 0x4c8   :  { %v2076_v43 = vadd.f32 %v2498_v39, %v2035_v41 }
 0x4e1   :  { %v2154_v44 = vpop.f32.mrb[20].mxu0 }
 0x4e2   :  { %v2556_v45 = vpop.f32.mrb[21].mxu0 }
 0x4e3   :  { %v2157_v46 = vpop.f32.mrb[22].mxu0 }
 0x4e4   :  { %v2557_v47 = vpop.f32.mrb[23].mxu0 }
 0x500   :  { %v2515_v48 = vpop.f32.mrb[16].mxu1 }
 0x501   :  { %v2516_v49 = vpop.f32.mrb[17].mxu1 }
 0x502   :  { %v2517_v50 = vadd.f32 %v2516_v49, %v2515_v48  ;;  %v2518_v51 = vpop.f32.mrb[18].mxu1 }
 0x503   :  { %v2519_v52 = vpop.f32.mrb[19].mxu1 }
 0x504   :  { %v2114_v53 = vadd.f32 %v2517_v50, %v2073_v40  ;;  %v2520_v42 = vadd.f32 %v2519_v52, %v2518_v51 }
 0x506   :  { %v2155_v54 = vadd.f32 %v2154_v44, %v2114_v53  ;;  %v2117_v55 = vadd.f32 %v2520_v42, %v2076_v43 }
 0x508   :  { %v2161_v56 = vmul.f32 0.5, %v2155_v54  ;;  %v2158_v57 = vadd.f32 %v2157_v46, %v2117_v55 }
 0x50a   :  { %2865 = vtanh.f32 %v2161_v56  ;;  %v2162_v58 = vmul.f32 0.5, %v2158_v57 }
 0x50c   :  { %2867 = vtanh.f32 %v2162_v58 }
 0x514   :  { %v2866_v59 = vpop.eup %2865 }
 0x515   :  { %v2165_v60 = vmul.f32 0.5, %v2866_v59 }
 0x516   :  { %v2868_v61 = vpop.eup %2867 }
 0x517   :  { %v2166_v62 = vmul.f32 0.5, %v2868_v61  ;;  %v2167_v63 = vadd.f32 0.5, %v2165_v60 }
 0x519   :  { %v2168_v2 = vadd.f32 0.5, %v2166_v62 }
 0x51b   :  { %v2428_v3 = vpack.c.bf16 %v2168_v2, %v2167_v63 }
 0x51d   :  { %2429 = vst [vmem:[#allocation13] sm:$0xff] %v2428_v3  }
 0x51e   :  { %3012 = shalt.err (!%p3009_p10)
}
 0x51f   :  { %s3013_s22 = scalar_lea.hbm %s3285_s11, 128 }
 0x520   :  { %p3014_p11 = scmp.ne.s32.totalorder %s3285_s11, %s3013_s22  ;;  %p3017_p12 = scmp.lt.u32.totalorder %s3013_s22, %s3285_s11 }
 0x522   :  { %p3019_p13 = pnand %p3017_p12, %p3014_p11 }
 0x524   :  { %3022 = shalt.err (!%p3019_p13)
}
 0x525   :  { %2190 = dma.vmem_to_hbm [thread:$0]  %s2185_s26, 128, %s3285_s11, [#allocation4], %s3034_s27, %s3034_s27, %s3035_s28  }
 0x526   :  { %3031 = dma.done.wait [#allocation4], 128  }
 0x527   :  { %3032 = vsyncadd [#allocation4], 4294967168 }
 0x528   :  { %2194 = vsyncpa [#allocation3], 1 }
 0x529   :  { %2195 = vsyncpa [#allocation6], 1 }
 0x52a   :  { %2196 = vsyncpa [#allocation9], 1 }
 0x52b   :  { %2197 = vsyncpa [#allocation12], 1 }
 0x52c   :  { %2198 = vsyncpa [#allocation4], 1 }

</bundles_post_ra>
